<compile_context>
chip_gen: v6e
topology: v6e:2x2x1
jax: 0.10.0
libtpu: 0.0.40
codegen_flags: <defaults>
</compile_context>

<pallas_src>
import functools

import jax
import jax.numpy as jnp
from jax.experimental import pallas as pl
from jax.experimental.pallas import tpu as pltpu

_EPS = 1e-5
_LANE = 128
EXPANSION = 4


# ---------------------------------------------------------------------------
# Generation-aware VMEM / core model
# ---------------------------------------------------------------------------
def _vmem_capacity_bytes():
    try:
        return int(pltpu.get_tpu_info().vmem_capacity_bytes)
    except Exception:
        return 64 * 1024 * 1024            # conservative (v7x-sized) fallback


_VMEM_CAP = _vmem_capacity_bytes()
if _VMEM_CAP >= 100 * 1024 * 1024:         # v5e / v6e: 128 MiB VMEM, 1 TensorCore
    _VMEM_LIMIT = 96 * 1024 * 1024
    _VMEM_BUDGET = 48 * 1024 * 1024
    _N_CORES = 1
else:                                      # v7x-class: 64 MiB VMEM, 2 TensorCores
    _VMEM_LIMIT = 32 * 1024 * 1024
    _VMEM_BUDGET = 20 * 1024 * 1024
    _N_CORES = 2


# ---------------------------------------------------------------------------
# small padding helpers (wrapper-side layout glue)
# ---------------------------------------------------------------------------
def _round_up(v, m):
    return (v + m - 1) // m * m


def _pad_last(a, c):
    pad = c - a.shape[-1]
    if pad == 0:
        return a
    return jnp.pad(a, [(0, 0)] * (a.ndim - 1) + [(0, pad)])


def _pad_rows(a, m):
    pad = m - a.shape[0]
    if pad == 0:
        return a
    return jnp.pad(a, ((0, pad), (0, 0)))


def _pad2(w, kp, npad):
    return jnp.pad(w, ((0, kp - w.shape[0]), (0, npad - w.shape[1])))


# ---------------------------------------------------------------------------
# Pallas kernels
# ---------------------------------------------------------------------------
def _mm_bias_kernel(x_ref, w_ref, b_ref, o_ref, *, relu):
    acc = jnp.dot(x_ref[...], w_ref[...], preferred_element_type=jnp.float32)
    y = acc + b_ref[...]
    if relu:
        y = jnp.maximum(y, 0.0)
    o_ref[...] = y.astype(o_ref.dtype)


def _mm_bias_res_relu_kernel(x_ref, w_ref, r_ref, b_ref, o_ref):
    # identity shortcut: relu(x @ w + b + residual)
    acc = jnp.dot(x_ref[...], w_ref[...], preferred_element_type=jnp.float32)
    acc = acc + r_ref[...].astype(jnp.float32) + b_ref[...]
    o_ref[...] = jnp.maximum(acc, 0.0).astype(o_ref.dtype)


def _mm2_bias_relu_kernel(x1_ref, w1_ref, x2_ref, w2_ref, b_ref, o_ref):
    # projection shortcut fused into stage 3: relu(x1@w1 + x2@w2 + b)
    acc = jnp.dot(x1_ref[...], w1_ref[...], preferred_element_type=jnp.float32)
    acc = acc + jnp.dot(x2_ref[...], w2_ref[...],
                        preferred_element_type=jnp.float32)
    o_ref[...] = jnp.maximum(acc + b_ref[...], 0.0).astype(o_ref.dtype)


def _conv3x3_bn_relu_kernel(xs_ref, w_ref, b_ref, o_ref, *, runs, mo, shift_lhs):
    # xs_ref: (1, Lx, G*C) bf16  -- one image, flattened (row, col) x channels
    # w_ref : (9*C, Cout) bf16   -- tap weights stacked along K per run
    # runs  : static tuple of (row_off, chan_off, k_width, weight_row_off)
    acc = None
    for (off, ch, kw_, wofs) in runs:
        w_t = w_ref[wofs:wofs + kw_, :]
        if shift_lhs:
            # shift the bf16 LHS (half the shifted bytes, no surplus rows)
            p = jnp.dot(xs_ref[0, off:off + mo, ch:ch + kw_], w_t,
                        preferred_element_type=jnp.float32)
        else:
            # fallback: aligned full-row load, shift the f32 product
            p = jnp.dot(xs_ref[0, :, ch:ch + kw_], w_t,
                        preferred_element_type=jnp.float32)[off:off + mo]
        acc = p if acc is None else acc + p       # init with first dot, no zeroing
    o_ref[0] = jnp.maximum(acc + b_ref[...], 0.0).astype(o_ref.dtype)


# ---------------------------------------------------------------------------
# Capability probe: non-8-aligned bf16 sublane slice feeding the MXU
# ---------------------------------------------------------------------------
@functools.lru_cache(maxsize=None)
def _bf16_row_shift_supported():
    def k(x_ref, w_ref, o_ref):
        o_ref[...] = jnp.dot(x_ref[3:11, :], w_ref[...],
                             preferred_element_type=jnp.float32)

    try:
        x = jnp.zeros((16, 128), jnp.bfloat16)
        w = jnp.zeros((128, 128), jnp.bfloat16)
        out = pl.pallas_call(
            k, out_shape=jax.ShapeDtypeStruct((8, 128), jnp.float32))(x, w)
        jax.block_until_ready(out)
        return True
    except Exception:
        return False


# ---------------------------------------------------------------------------
# Tile selection (weight-resident, pad-free, generation-aware)
# ---------------------------------------------------------------------------
def _select_tiles(m, k_total, nc):
    """Pick (tm, tn).

    tn == nc whenever the full weight fits (its block index is then constant
    over the whole grid, so it is DMA'd exactly once).  tm prefers divisors of
    the row count (no pad/slice copies); on single-TC chips the largest fitting
    tile wins, on multi-TC chips >= 2 programs per core are preferred."""
    def fits(tm, tn):
        need = (2 * tm * k_total * 2       # double-buffered bf16 activation tiles
                + 2 * k_total * tn * 2     # bf16 weight tile buffers
                + 2 * tm * tn * 2          # bf16 output tile buffers
                + tm * tn * 4)             # f32 accumulator / epilogue temporaries
        return need <= _VMEM_BUDGET

    tn_cands = [nc] + [t for t in (512, 256) if t < nc and nc % t == 0]
    if nc > 128 and nc % 256 != 0:
        tn_cands.append(128)               # last resort (half-MXU on v6e/v7x)
    tn = next((t for t in tn_cands if fits(128, t)), min(nc, 128))

    m8 = _round_up(m, 8)
    cands = [m8] + [t for t in (1024, 512, 256, 128) if t <= m8]
    cands = [t for t in cands if fits(t, tn)] or [min(m8, 128)]
    no_pad = [t for t in cands if m8 % t == 0]
    pool = no_pad or cands
    if _N_CORES > 1:
        busy = [t for t in pool if (m8 + t - 1) // t >= 2 * _N_CORES]
        if busy:
            pool = busy
    return max(pool), tn


# ---------------------------------------------------------------------------
# Pallas wrappers
# ---------------------------------------------------------------------------
def fused_matmul(x, w, b, *, relu=True, x2=None, w2=None, residual=None,
                 out_dtype=jnp.bfloat16):
    """out = act(x @ w [+ x2 @ w2] [+ residual] + b), row/col tiled Pallas call."""
    m, k = x.shape
    nc = w.shape[1]                       # nc is a multiple of 128 (padded)
    k_total = k
    if x2 is not None:
        k_total += x2.shape[1]
    if residual is not None:
        k_total += nc
    tm, tn = _select_tiles(m, k_total, nc)
    mp = _round_up(m, tm)
    grid = (mp // tm, nc // tn)

    args = [_pad_rows(x, mp), w]
    in_specs = [
        pl.BlockSpec((tm, k), lambda i, j: (i, 0)),
        pl.BlockSpec((k, tn), lambda i, j: (0, j)),
    ]
    if x2 is not None:
        k2 = x2.shape[1]
        args += [_pad_rows(x2, mp), w2]
        in_specs += [
            pl.BlockSpec((tm, k2), lambda i, j: (i, 0)),
            pl.BlockSpec((k2, tn), lambda i, j: (0, j)),
        ]
        kernel = _mm2_bias_relu_kernel
    elif residual is not None:
        args.append(_pad_rows(residual, mp))
        in_specs.append(pl.BlockSpec((tm, tn), lambda i, j: (i, j)))
        kernel = _mm_bias_res_relu_kernel
    else:
        kernel = functools.partial(_mm_bias_kernel, relu=relu)
    args.append(b)
    in_specs.append(pl.BlockSpec((1, tn), lambda i, j: (0, j)))

    out = pl.pallas_call(
        kernel,
        out_shape=jax.ShapeDtypeStruct((mp, nc), out_dtype),
        grid=grid,
        in_specs=in_specs,
        out_specs=pl.BlockSpec((tm, tn), lambda i, j: (i, j)),
        compiler_params=pltpu.CompilerParams(
            dimension_semantics=("parallel", "parallel"),
            vmem_limit_bytes=_VMEM_LIMIT,
        ),
    )(*args)
    return out[:m] if mp != m else out


def conv3x3_bn_relu(xs, w_stack, bias, *, runs, mo):
    """Fused 3x3 conv + BN(scale folded) + ReLU, grouped taps, no im2col."""
    n, lx, gc = xs.shape
    ktot, cout = w_stack.shape
    kernel = functools.partial(_conv3x3_bn_relu_kernel, runs=tuple(runs), mo=mo,
                               shift_lhs=_bf16_row_shift_supported())
    # TODO(synk): tile over output-row chunks within an image (grid=(n, tiles)
    # with a halo) to feed both v7x TensorCores at small batch.
    return pl.pallas_call(
        kernel,
        out_shape=jax.ShapeDtypeStruct((n, mo, cout), jnp.bfloat16),
        grid=(n,),
        in_specs=[
            pl.BlockSpec((1, lx, gc), lambda i: (i, 0, 0)),
            pl.BlockSpec((ktot, cout), lambda i: (0, 0)),
            pl.BlockSpec((1, cout), lambda i: (0, 0)),
        ],
        out_specs=pl.BlockSpec((1, mo, cout), lambda i: (i, 0, 0)),
        compiler_params=pltpu.CompilerParams(
            dimension_semantics=("parallel",),
            vmem_limit_bytes=_VMEM_LIMIT,
        ),
    )(xs, w_stack, bias)


def _build_conv3_runs(s, ws, c, c_p, w_kkio):
    """Group 3x3 taps that share a flat-row offset and occupy consecutive
    space-to-depth channel slots into single wide-K dots.  Returns the static
    run descriptors and the (9*c_p, c_p) stacked, zero-padded weight."""
    by_off = {}
    for kh in range(3):
        for kw in range(3):
            off = (kh // s) * ws + (kw // s)
            slot = (kh % s) * s + (kw % s)
            by_off.setdefault(off, []).append((slot, (kh, kw)))
    runs, blocks, wofs = [], [], 0
    for off in sorted(by_off):
        entries = sorted(by_off[off])
        i = 0
        while i < len(entries):
            j = i
            while j + 1 < len(entries) and entries[j + 1][0] == entries[j][0] + 1:
                j += 1
            group = entries[i:j + 1]
            kwidth = len(group) * c_p
            blk = jnp.zeros((kwidth, c_p), jnp.float32)
            for t, (_, (kh, kw)) in enumerate(group):
                blk = blk.at[t * c_p:t * c_p + c, :c].set(w_kkio[kh, kw])
            runs.append((off, group[0][0] * c_p, kwidth, wofs))
            blocks.append(blk)
            wofs += kwidth
            i = j + 1
    return tuple(runs), jnp.concatenate(blocks, axis=0)


# ---------------------------------------------------------------------------
# Parameter init (deterministic, synthetic) — shapes match the PyTorch module
# ---------------------------------------------------------------------------
def init_params(key, in_channels, out_channels, stride=1):
    keys = jax.random.split(key, 8)

    def conv_w(k, cout, cin, kh, kw):
        fan_in = cin * kh * kw
        return jax.random.normal(k, (cout, cin, kh, kw), jnp.float32) / jnp.sqrt(
            float(fan_in)
        )

    def bn_params(k, c):
        k1, k2, k3, k4 = jax.random.split(k, 4)
        gamma = 1.0 + 0.1 * jax.random.normal(k1, (c,), jnp.float32)
        beta = 0.1 * jax.random.normal(k2, (c,), jnp.float32)
        running_mean = 0.1 * jax.random.normal(k3, (c,), jnp.float32)
        running_var = jax.nn.softplus(jax.random.normal(k4, (c,), jnp.float32)) + 0.5
        return gamma, beta, running_mean, running_var

    cexp = out_channels * EXPANSION
    params = {
        "w1": conv_w(keys[0], out_channels, in_channels, 1, 1),
        "bn1": bn_params(keys[1], out_channels),
        "w2": conv_w(keys[2], out_channels, out_channels, 3, 3),
        "bn2": bn_params(keys[3], out_channels),
        "w3": conv_w(keys[4], cexp, out_channels, 1, 1),
        "bn3": bn_params(keys[5], cexp),
    }
    if stride != 1 or in_channels != cexp:
        params["w_sc"] = conv_w(keys[6], cexp, in_channels, 1, 1)
        params["bn_sc"] = bn_params(keys[7], cexp)
    return params


def _fold_bn(bn):
    gamma, beta, mean, var = bn
    scale = gamma / jnp.sqrt(var + _EPS)
    return scale, beta - mean * scale


# ---------------------------------------------------------------------------
# Bottleneck forward (Pallas-backed)
# ---------------------------------------------------------------------------
def bottleneck_forward(params, x_nchw, stride):
    n, cin, h, w = x_nchw.shape
    c = params["w1"].shape[0]
    c4 = params["w3"].shape[0]
    cin_p = _round_up(cin, _LANE)
    c_p = _round_up(c, _LANE)
    c4_p = _round_up(c4, _LANE)

    x = jnp.transpose(x_nchw, (0, 2, 3, 1))                        # NCHW -> NHWC
    xb = _pad_last(x, cin_p).astype(jnp.bfloat16)                  # lane-dense bf16

    s1, b1 = _fold_bn(params["bn1"])
    s2, b2 = _fold_bn(params["bn2"])
    s3, b3 = _fold_bn(params["bn3"])

    # ---- stage 1: 1x1 conv (BN scale folded into W) + bias + ReLU ----
    w1 = params["w1"][:, :, 0, 0].T * s1[None, :]                  # (cin, c) f32
    w1p = _pad2(w1, cin_p, c_p).astype(jnp.bfloat16)
    b1p = _pad_last(b1.reshape(1, -1), c_p).astype(jnp.float32)
    h1 = fused_matmul(xb.reshape(n * h * w, cin_p), w1p, b1p, relu=True)
    h1 = h1.reshape(n, h, w, c_p)

    # ---- stage 2: 3x3 conv, stride s, pad 1, + BN + ReLU (no im2col) ----
    s = stride
    ho = (h - 1) // s + 1
    wo = (w - 1) // s + 1
    hp = jnp.pad(h1, ((0, 0), (1, 1), (1, 1), (0, 0)))             # spatial pad=1
    hpad, wpad = h + 2, w + 2
    hs, ws = -(-hpad // s), -(-wpad // s)
    if s > 1:                                                      # space-to-depth
        hp = jnp.pad(hp, ((0, 0), (0, hs * s - hpad), (0, ws * s - wpad), (0, 0)))
        hp = hp.reshape(n, hs, s, ws, s, c_p)
        hp = hp.transpose(0, 1, 3, 2, 4, 5).reshape(n, hs, ws, s * s * c_p)
    gc = s * s * c_p

    w2 = jnp.transpose(params["w2"], (2, 3, 1, 0)) * s2[None, None, None, :]
    runs, w2_stack = _build_conv3_runs(s, ws, c, c_p, w2)          # grouped taps
    w2p = w2_stack.astype(jnp.bfloat16)
    b2p = _pad_last(b2.reshape(1, -1), c_p).astype(jnp.float32)

    mo = ho * ws                       # flat output rows / image (incl. W overhang)
    max_off = max(r[0] for r in runs)
    lx = _round_up(max(hs * ws, mo + max_off), 8)
    xs = hp.reshape(n, hs * ws, gc)
    xs = jnp.pad(xs, ((0, 0), (0, lx - hs * ws), (0, 0)))
    h2 = conv3x3_bn_relu(xs, w2p, b2p, runs=runs, mo=mo)           # (n, mo, c_p) bf16
    h2f = h2.reshape(n * mo, c_p)

    # ---- shortcut input: stride-sampled x, matched to the same row layout ----
    x_s = xb[:, ::s, ::s, :]                                       # (n, ho, wo, cin_p)
    x_s = jnp.pad(x_s, ((0, 0), (0, 0), (0, ws - wo), (0, 0)))
    x_s = x_s.reshape(n * mo, cin_p)

    # ---- stage 3: 1x1 conv + BN + shortcut + ReLU, fully fused, bf16 store ----
    w3 = params["w3"][:, :, 0, 0].T * s3[None, :]                  # (c, c4)
    w3p = _pad2(w3, c_p, c4_p).astype(jnp.bfloat16)
    if "w_sc" in params:
        ssc, bsc = _fold_bn(params["bn_sc"])
        wsc = params["w_sc"][:, :, 0, 0].T * ssc[None, :]          # (cin, c4)
        wscp = _pad2(wsc, cin_p, c4_p).astype(jnp.bfloat16)
        bp = _pad_last((b3 + bsc).reshape(1, -1), c4_p).astype(jnp.float32)
        out = fused_matmul(h2f, w3p, bp, relu=True, x2=x_s, w2=wscp)
    else:
        # identity shortcut (stride==1 and cin == c4)
        bp = _pad_last(b3.reshape(1, -1), c4_p).astype(jnp.float32)
        out = fused_matmul(h2f, w3p, bp, relu=True, residual=x_s)

    out = out.reshape(n, ho, ws, c4_p)[:, :, :wo, :c4]
    return jnp.transpose(out, (0, 3, 1, 2)).astype(jnp.float32)    # NHWC -> NCHW


# ---------------------------------------------------------------------------
# Pure-JAX reference (lax.conv) for correctness check
# ---------------------------------------------------------------------------
def reference_forward(params, x, stride):
    def conv(a, w, st, pad):
        return jax.lax.conv_general_dilated(
            a, w, (st, st), [(pad, pad), (pad, pad)],
            dimension_numbers=("NCHW", "OIHW", "NCHW"),
        )

    def bn(a, p):
        scale, bias = _fold_bn(p)
        return a * scale.reshape(1, -1, 1, 1) + bias.reshape(1, -1, 1, 1)

    out = jax.nn.relu(bn(conv(x, params["w1"], 1, 0), params["bn1"]))
    out = jax.nn.relu(bn(conv(out, params["w2"], stride, 1), params["bn2"]))
    out = bn(conv(out, params["w3"], 1, 0), params["bn3"])
    if "w_sc" in params:
        sc = bn(conv(x, params["w_sc"], stride, 0), params["bn_sc"])
    else:
        sc = x
    return jax.nn.relu(out + sc)


if __name__ == "__main__":
    key = jax.random.PRNGKey(0)
    kx, kp = jax.random.split(key)

    n, cin, h, w = 2, 4, 16, 16
    out_channels, stride = 4, 2

    x = jax.random.normal(kx, (n, cin, h, w), jnp.float32)
    params = init_params(kp, cin, out_channels, stride)

    fwd = jax.jit(bottleneck_forward, static_argnums=2)
    y = jax.block_until_ready(fwd(params, x, stride))

    assert y.shape == (n, out_channels * EXPANSION, h // stride, w // stride)

    y_ref = reference_forward(params, x, stride)
    # bf16 activations/weights/stores with f32 accumulation -> relaxed tolerance
    assert jnp.allclose(y, y_ref, atol=5e-2, rtol=5e-2), "mismatch vs JAX reference"

    print("KERNEL_OK")
</pallas_src>

<mosaic_0001>
module attributes {stable_mosaic.version = 11 : i64} {
  func.func @_mm_bias_kernel(%arg0: i32, %arg1: i32, %arg2: memref<128x128xbf16, #tpu.memory_space<vmem>>, %arg3: memref<128x128xbf16, #tpu.memory_space<vmem>>, %arg4: memref<1x128xf32, #tpu.memory_space<vmem>>, %arg5: memref<128x128xbf16, #tpu.memory_space<vmem>>) attributes {dimension_semantics = [#tpu.dimension_semantics<parallel>, #tpu.dimension_semantics<parallel>], iteration_bounds = array<i64: 4, 1>, scalar_prefetch = 0 : i64, scratch_operands = 0 : i64, tpu.core_type = #tpu.core_type<tc>, window_params = [{transform_indices = @transform_0, window_bounds = array<i64: 128, 128>}, {transform_indices = @transform_1, window_bounds = array<i64: 128, 128>}, {transform_indices = @transform_2, window_bounds = array<i64: 1, 128>}, {transform_indices = @transform_3, window_bounds = array<i64: 128, 128>}]} {
    %c0 = arith.constant 0 : index
    %c0_0 = arith.constant 0 : index
    %0 = vector.load %arg2[%c0, %c0_0] : memref<128x128xbf16, #tpu.memory_space<vmem>>, vector<128x128xbf16>
    %c0_1 = arith.constant 0 : index
    %c0_2 = arith.constant 0 : index
    %1 = vector.load %arg3[%c0_1, %c0_2] : memref<128x128xbf16, #tpu.memory_space<vmem>>, vector<128x128xbf16>
    %cst = arith.constant dense<0.000000e+00> : vector<128x128xf32>
    %2 = tpu.matmul %0, %1, %cst {dimension_numbers = #tpu.dot_dimension_numbers<[1], [0], [0], [1], [0, 0, 1, 1], [], []>} : vector<128x128xbf16>, vector<128x128xbf16>, vector<128x128xf32> -> vector<128x128xf32>
    %c0_3 = arith.constant 0 : index
    %c0_4 = arith.constant 0 : index
    %3 = vector.load %arg4[%c0_3, %c0_4] : memref<1x128xf32, #tpu.memory_space<vmem>>, vector<1x128xf32>
    %4 = vector.broadcast %3 : vector<1x128xf32> to vector<128x128xf32>
    %5 = arith.addf %2, %4 : vector<128x128xf32>
    %cst_5 = arith.constant 0.000000e+00 : f32
    %6 = vector.broadcast %cst_5 : f32 to vector<128x128xf32>
    %7 = arith.maximumf %5, %6 : vector<128x128xf32>
    %8 = arith.truncf %7 : vector<128x128xf32> to vector<128x128xbf16>
    %c0_6 = arith.constant 0 : index
    %c0_7 = arith.constant 0 : index
    %9 = vector.load %arg5[%c0_6, %c0_7] : memref<128x128xbf16, #tpu.memory_space<vmem>>, vector<128x128xbf16>
    tpu.vector_store %arg5[%c0_6, %c0_7], %8 {strides = array<i32>} : memref<128x128xbf16, #tpu.memory_space<vmem>>, vector<128x128xbf16>,
    return
  }
  func.func @transform_0(%arg0: i32, %arg1: i32) -> (i32, i32) {
    %c0_i32 = arith.constant 0 : i32
    %c0_i32_0 = arith.constant 0 : i32
    return %arg0, %c0_i32 : i32, i32
  }
  func.func @transform_1(%arg0: i32, %arg1: i32) -> (i32, i32) {
    %c0_i32 = arith.constant 0 : i32
    %c0_i32_0 = arith.constant 0 : i32
    return %c0_i32, %arg1 : i32, i32
  }
  func.func @transform_2(%arg0: i32, %arg1: i32) -> (i32, i32) {
    %c0_i32 = arith.constant 0 : i32
    %c0_i32_0 = arith.constant 0 : i32
    return %c0_i32, %arg1 : i32, i32
  }
  func.func @transform_3(%arg0: i32, %arg1: i32) -> (i32, i32) {
    %c0_i32 = arith.constant 0 : i32
    return %arg0, %arg1 : i32, i32
  }
}

module attributes {stable_mosaic.version = 11 : i64} {
  func.func @_conv3x3_bn_relu_kernel(%arg0: i32, %arg1: memref<1x88x512xbf16, #tpu.memory_space<vmem>>, %arg2: memref<1152x128xbf16, #tpu.memory_space<vmem>>, %arg3: memref<1x128xf32, #tpu.memory_space<vmem>>, %arg4: memref<1x72x128xbf16, #tpu.memory_space<vmem>>) attributes {dimension_semantics = [#tpu.dimension_semantics<parallel>], iteration_bounds = array<i64: 2>, scalar_prefetch = 0 : i64, scratch_operands = 0 : i64, tpu.core_type = #tpu.core_type<tc>, window_params = [{transform_indices = @transform_0, window_bounds = array<i64: 1, 88, 512>}, {pipeline_mode = #tpu.pipeline_mode<synchronous>, transform_indices = @transform_1, window_bounds = array<i64: 1152, 128>}, {pipeline_mode = #tpu.pipeline_mode<synchronous>, transform_indices = @transform_2, window_bounds = array<i64: 1, 128>}, {transform_indices = @transform_3, window_bounds = array<i64: 1, 72, 128>}]} {
    %c0 = arith.constant 0 : index
    %c0_0 = arith.constant 0 : index
    %0 = vector.load %arg2[%c0, %c0_0] : memref<1152x128xbf16, #tpu.memory_space<vmem>>, vector<512x128xbf16>
    %c0_1 = arith.constant 0 : index
    %c0_2 = arith.constant 0 : index
    %c0_3 = arith.constant 0 : index
    %1 = vector.load %arg1[%c0_1, %c0_2, %c0_3] : memref<1x88x512xbf16, #tpu.memory_space<vmem>>, vector<1x72x512xbf16>
    %2 = vector.shape_cast %1 : vector<1x72x512xbf16> to vector<72x512xbf16>
    %cst = arith.constant dense<0.000000e+00> : vector<72x128xf32>
    %3 = tpu.matmul %2, %0, %cst {dimension_numbers = #tpu.dot_dimension_numbers<[1], [0], [0], [1], [0, 0, 1, 1], [], []>} : vector<72x512xbf16>, vector<512x128xbf16>, vector<72x128xf32> -> vector<72x128xf32>
    %c512 = arith.constant 512 : index
    %c0_4 = arith.constant 0 : index
    %4 = vector.load %arg2[%c512, %c0_4] : memref<1152x128xbf16, #tpu.memory_space<vmem>>, vector<128x128xbf16>
    %c0_5 = arith.constant 0 : index
    %c1 = arith.constant 1 : index
    %c0_6 = arith.constant 0 : index
    %5 = vector.load %arg1[%c0_5, %c1, %c0_6] : memref<1x88x512xbf16, #tpu.memory_space<vmem>>, vector<1x72x128xbf16>
    %6 = vector.shape_cast %5 : vector<1x72x128xbf16> to vector<72x128xbf16>
    %cst_7 = arith.constant dense<0.000000e+00> : vector<72x128xf32>
    %7 = tpu.matmul %6, %4, %cst_7 {dimension_numbers = #tpu.dot_dimension_numbers<[1], [0], [0], [1], [0, 0, 1, 1], [], []>} : vector<72x128xbf16>, vector<128x128xbf16>, vector<72x128xf32> -> vector<72x128xf32>
    %8 = arith.addf %3, %7 : vector<72x128xf32>
    %c640 = arith.constant 640 : index
    %c0_8 = arith.constant 0 : index
    %9 = vector.load %arg2[%c640, %c0_8] : memref<1152x128xbf16, #tpu.memory_space<vmem>>, vector<128x128xbf16>
    %c0_9 = arith.constant 0 : index
    %c1_10 = arith.constant 1 : index
    %c256 = arith.constant 256 : index
    %10 = vector.load %arg1[%c0_9, %c1_10, %c256] : memref<1x88x512xbf16, #tpu.memory_space<vmem>>, vector<1x72x128xbf16>
    %11 = vector.shape_cast %10 : vector<1x72x128xbf16> to vector<72x128xbf16>
    %cst_11 = arith.constant dense<0.000000e+00> : vector<72x128xf32>
    %12 = tpu.matmul %11, %9, %cst_11 {dimension_numbers = #tpu.dot_dimension_numbers<[1], [0], [0], [1], [0, 0, 1, 1], [], []>} : vector<72x128xbf16>, vector<128x128xbf16>, vector<72x128xf32> -> vector<72x128xf32>
    %13 = arith.addf %8, %12 : vector<72x128xf32>
    %c768 = arith.constant 768 : index
    %c0_12 = arith.constant 0 : index
    %14 = vector.load %arg2[%c768, %c0_12] : memref<1152x128xbf16, #tpu.memory_space<vmem>>, vector<256x128xbf16>
    %c0_13 = arith.constant 0 : index
    %c9 = arith.constant 9 : index
    %c0_14 = arith.constant 0 : index
    %15 = vector.load %arg1[%c0_13, %c9, %c0_14] : memref<1x88x512xbf16, #tpu.memory_space<vmem>>, vector<1x72x256xbf16>
    %16 = vector.shape_cast %15 : vector<1x72x256xbf16> to vector<72x256xbf16>
    %cst_15 = arith.constant dense<0.000000e+00> : vector<72x128xf32>
    %17 = tpu.matmul %16, %14, %cst_15 {dimension_numbers = #tpu.dot_dimension_numbers<[1], [0], [0], [1], [0, 0, 1, 1], [], []>} : vector<72x256xbf16>, vector<256x128xbf16>, vector<72x128xf32> -> vector<72x128xf32>
    %18 = arith.addf %13, %17 : vector<72x128xf32>
    %c1024 = arith.constant 1024 : index
    %c0_16 = arith.constant 0 : index
    %19 = vector.load %arg2[%c1024, %c0_16] : memref<1152x128xbf16, #tpu.memory_space<vmem>>, vector<128x128xbf16>
    %c0_17 = arith.constant 0 : index
    %c10 = arith.constant 10 : index
    %c0_18 = arith.constant 0 : index
    %20 = vector.load %arg1[%c0_17, %c10, %c0_18] : memref<1x88x512xbf16, #tpu.memory_space<vmem>>, vector<1x72x128xbf16>
    %21 = vector.shape_cast %20 : vector<1x72x128xbf16> to vector<72x128xbf16>
    %cst_19 = arith.constant dense<0.000000e+00> : vector<72x128xf32>
    %22 = tpu.matmul %21, %19, %cst_19 {dimension_numbers = #tpu.dot_dimension_numbers<[1], [0], [0], [1], [0, 0, 1, 1], [], []>} : vector<72x128xbf16>, vector<128x128xbf16>, vector<72x128xf32> -> vector<72x128xf32>
    %23 = arith.addf %18, %22 : vector<72x128xf32>
    %c0_20 = arith.constant 0 : index
    %c0_21 = arith.constant 0 : index
    %24 = vector.load %arg3[%c0_20, %c0_21] : memref<1x128xf32, #tpu.memory_space<vmem>>, vector<1x128xf32>
    %25 = vector.broadcast %24 : vector<1x128xf32> to vector<72x128xf32>
    %26 = arith.addf %23, %25 : vector<72x128xf32>
    %cst_22 = arith.constant 0.000000e+00 : f32
    %27 = vector.broadcast %cst_22 : f32 to vector<72x128xf32>
    %28 = arith.maximumf %26, %27 : vector<72x128xf32>
    %29 = arith.truncf %28 : vector<72x128xf32> to vector<72x128xbf16>
    %c0_23 = arith.constant 0 : index
    %c0_24 = arith.constant 0 : index
    %c0_25 = arith.constant 0 : index
    %30 = vector.load %arg4[%c0_23, %c0_24, %c0_25] : memref<1x72x128xbf16, #tpu.memory_space<vmem>>, vector<1x72x128xbf16>
    %31 = vector.shape_cast %30 : vector<1x72x128xbf16> to vector<72x128xbf16>
    %32 = vector.shape_cast %29 : vector<72x128xbf16> to vector<1x72x128xbf16>
    tpu.vector_store %arg4[%c0_23, %c0_24, %c0_25], %32 {strides = array<i32>} : memref<1x72x128xbf16, #tpu.memory_space<vmem>>, vector<1x72x128xbf16>,
    return
  }
  func.func @transform_0(%arg0: i32) -> (i32, i32, i32) {
    %c0_i32 = arith.constant 0 : i32
    %c0_i32_0 = arith.constant 0 : i32
    %c0_i32_1 = arith.constant 0 : i32
    return %arg0, %c0_i32, %c0_i32_0 : i32, i32, i32
  }
  func.func @transform_1(%arg0: i32) -> (i32, i32) {
    %c0_i32 = arith.constant 0 : i32
    %c0_i32_0 = arith.constant 0 : i32
    %c0_i32_1 = arith.constant 0 : i32
    return %c0_i32, %c0_i32_0 : i32, i32
  }
  func.func @transform_2(%arg0: i32) -> (i32, i32) {
    %c0_i32 = arith.constant 0 : i32
    %c0_i32_0 = arith.constant 0 : i32
    %c0_i32_1 = arith.constant 0 : i32
    return %c0_i32, %c0_i32_0 : i32, i32
  }
  func.func @transform_3(%arg0: i32) -> (i32, i32, i32) {
    %c0_i32 = arith.constant 0 : i32
    %c0_i32_0 = arith.constant 0 : i32
    %c0_i32_1 = arith.constant 0 : i32
    return %arg0, %c0_i32, %c0_i32_0 : i32, i32, i32
  }
}

module attributes {stable_mosaic.version = 11 : i64} {
  func.func @_mm2_bias_relu_kernel(%arg0: i32, %arg1: i32, %arg2: memref<144x128xbf16, #tpu.memory_space<vmem>>, %arg3: memref<128x128xbf16, #tpu.memory_space<vmem>>, %arg4: memref<144x128xbf16, #tpu.memory_space<vmem>>, %arg5: memref<128x128xbf16, #tpu.memory_space<vmem>>, %arg6: memref<1x128xf32, #tpu.memory_space<vmem>>, %arg7: memref<144x128xbf16, #tpu.memory_space<vmem>>) attributes {dimension_semantics = [#tpu.dimension_semantics<parallel>, #tpu.dimension_semantics<parallel>], iteration_bounds = array<i64: 1, 1>, scalar_prefetch = 0 : i64, scratch_operands = 0 : i64, tpu.core_type = #tpu.core_type<tc>, window_params = [{transform_indices = @transform_0, window_bounds = array<i64: 144, 128>}, {transform_indices = @transform_1, window_bounds = array<i64: 128, 128>}, {transform_indices = @transform_2, window_bounds = array<i64: 144, 128>}, {transform_indices = @transform_3, window_bounds = array<i64: 128, 128>}, {transform_indices = @transform_4, window_bounds = array<i64: 1, 128>}, {transform_indices = @transform_5, window_bounds = array<i64: 144, 128>}]} {
    %c0 = arith.constant 0 : index
    %c0_0 = arith.constant 0 : index
    %0 = vector.load %arg2[%c0, %c0_0] : memref<144x128xbf16, #tpu.memory_space<vmem>>, vector<144x128xbf16>
    %c0_1 = arith.constant 0 : index
    %c0_2 = arith.constant 0 : index
    %1 = vector.load %arg3[%c0_1, %c0_2] : memref<128x128xbf16, #tpu.memory_space<vmem>>, vector<128x128xbf16>
    %cst = arith.constant dense<0.000000e+00> : vector<144x128xf32>
    %2 = tpu.matmul %0, %1, %cst {dimension_numbers = #tpu.dot_dimension_numbers<[1], [0], [0], [1], [0, 0, 1, 1], [], []>} : vector<144x128xbf16>, vector<128x128xbf16>, vector<144x128xf32> -> vector<144x128xf32>
    %c0_3 = arith.constant 0 : index
    %c0_4 = arith.constant 0 : index
    %3 = vector.load %arg4[%c0_3, %c0_4] : memref<144x128xbf16, #tpu.memory_space<vmem>>, vector<144x128xbf16>
    %c0_5 = arith.constant 0 : index
    %c0_6 = arith.constant 0 : index
    %4 = vector.load %arg5[%c0_5, %c0_6] : memref<128x128xbf16, #tpu.memory_space<vmem>>, vector<128x128xbf16>
    %cst_7 = arith.constant dense<0.000000e+00> : vector<144x128xf32>
    %5 = tpu.matmul %3, %4, %cst_7 {dimension_numbers = #tpu.dot_dimension_numbers<[1], [0], [0], [1], [0, 0, 1, 1], [], []>} : vector<144x128xbf16>, vector<128x128xbf16>, vector<144x128xf32> -> vector<144x128xf32>
    %6 = arith.addf %2, %5 : vector<144x128xf32>
    %c0_8 = arith.constant 0 : index
    %c0_9 = arith.constant 0 : index
    %7 = vector.load %arg6[%c0_8, %c0_9] : memref<1x128xf32, #tpu.memory_space<vmem>>, vector<1x128xf32>
    %8 = vector.broadcast %7 : vector<1x128xf32> to vector<144x128xf32>
    %9 = arith.addf %6, %8 : vector<144x128xf32>
    %cst_10 = arith.constant 0.000000e+00 : f32
    %10 = vector.broadcast %cst_10 : f32 to vector<144x128xf32>
    %11 = arith.maximumf %9, %10 : vector<144x128xf32>
    %12 = arith.truncf %11 : vector<144x128xf32> to vector<144x128xbf16>
    %c0_11 = arith.constant 0 : index
    %c0_12 = arith.constant 0 : index
    %13 = vector.load %arg7[%c0_11, %c0_12] : memref<144x128xbf16, #tpu.memory_space<vmem>>, vector<144x128xbf16>
    tpu.vector_store %arg7[%c0_11, %c0_12], %12 {strides = array<i32>} : memref<144x128xbf16, #tpu.memory_space<vmem>>, vector<144x128xbf16>,
    return
  }
  func.func @transform_0(%arg0: i32, %arg1: i32) -> (i32, i32) {
    %c0_i32 = arith.constant 0 : i32
    %c0_i32_0 = arith.constant 0 : i32
    return %arg0, %c0_i32 : i32, i32
  }
  func.func @transform_1(%arg0: i32, %arg1: i32) -> (i32, i32) {
    %c0_i32 = arith.constant 0 : i32
    %c0_i32_0 = arith.constant 0 : i32
    return %c0_i32, %arg1 : i32, i32
  }
  func.func @transform_2(%arg0: i32, %arg1: i32) -> (i32, i32) {
    %c0_i32 = arith.constant 0 : i32
    %c0_i32_0 = arith.constant 0 : i32
    return %arg0, %c0_i32 : i32, i32
  }
  func.func @transform_3(%arg0: i32, %arg1: i32) -> (i32, i32) {
    %c0_i32 = arith.constant 0 : i32
    %c0_i32_0 = arith.constant 0 : i32
    return %c0_i32, %arg1 : i32, i32
  }
  func.func @transform_4(%arg0: i32, %arg1: i32) -> (i32, i32) {
    %c0_i32 = arith.constant 0 : i32
    %c0_i32_0 = arith.constant 0 : i32
    return %c0_i32, %arg1 : i32, i32
  }
  func.func @transform_5(%arg0: i32, %arg1: i32) -> (i32, i32) {
    %c0_i32 = arith.constant 0 : i32
    return %arg0, %arg1 : i32, i32
  }
}

</mosaic_0001>

<bundles_post_ra>
// kernel: bottleneck_forward.3
= control target key start
LH: loop header
LB: loop body
LE: loop exit
PB: predicated region body
PF: predicated region fallthrough
CT: control target
= control target key end

     0   :  { %s913_s12 = smov 0   ;;  %s915_s13 = smov 0   ;;  %s1000_s0 = inlined_call_operand.vmem [shape: bf16[512,128], index: 0, kind: input, shape index: {}]   ;;  %s1001_s1 = inlined_call_operand.vmem [shape: bf16[128,128], index: 1, kind: input, shape index: {}]   ;;  %s1002_s2 = inlined_call_operand.vmem [shape: f32[1,128], index: 2, kind: input, shape index: {}]   ;;  %s1003_s3 = inlined_call_operand.vmem [shape: bf16[512,128], index: 3, kind: output, shape index: {}]  }
   0x1   :  { %s917_s14 = smov 0  }
   0x2 LB: > { %s25_s15 = sadd.s32 1, %s887_s13  ;;  %p662_p0 = scmp.ge.s32.totalorder %s891_s14, 1  ;;  %s891_s14 = sphi %s917_s14, %s13_s14   ;;  %s887_s13 = sphi %s915_s13, %s1005_s13   ;;  %s883_s12 = sphi %s913_s12, %s1004_s12  }
   0x3   : > { %p27_p1 = scmp.ge.s32.totalorder %s25_s15, 4  ;;  %p169_p2 = scmp.lt.s32.totalorder %s891_s14, 5 }
   0x5   : > { %s1007_s15 = smov (%p27_p1, %s25_s15), 0  ;;  %p170_p3 = pnand %p662_p0, %p169_p2 }
   0x6   : > { %s663_s18 = sshll.u32 (!%p170_p3), %s883_s12, 4 }
   0x7   : > { %173 = sbr.rel (%p170_p3) target bundleno = 259 (0x103), region = 32  ;;  %p204_p4 = scmp.lt.s32.totalorder (!%p170_p3), %s663_s18, 63 }
   0xc   : > { %v853_v0 = vld [vmem:[%s1001_s1 + $0x38] sm:$0xff]   ;;  %v854_v1 = vld [vmem:[%s1001_s1 + $0x30] sm:$0xff]   ;;  %s1009_s18 = smov (!%p204_p4, %s663_s18), 63  ;;  %v855_v2 = vld [vmem:[%s1001_s1 + $0x28] sm:$0xff]  }
   0xd   : > { %781 = vmatprep.subr.bf16.mxu0 %v853_v0  ;;  %813 = vmatprep.subr.bf16.mxu1 %v853_v0  ;;  %s664_s23 = sshll.u32 %s1009_s18, 2  ;;  %v856_v3 = vld [vmem:[%s1001_s1 + $0x20] sm:$0xff]   ;;  %v857_v6 = vld [vmem:[%s1001_s1 + $0x18] sm:$0xff]   ;;  %v858_v7 = vld [vmem:[%s1001_s1 + $0x10] sm:$0xff]  }
   0xe   : > { %782 = vmatpush3.bf16.msra.mxu0 %v853_v0  ;;  %821 = vmatpush3.bf16.msra.mxu1 %v853_v0  ;;  %s948_s26 = scalar_lea.vmem %s1000_s0, %s664_s23  ;;  %v859_v8 = vld [vmem:[%s1001_s1 + $0x8] sm:$0xff]   ;;  %v860_v9 = vld [vmem:[%s1001_s1] sm:$0xff]   ;;  %s981_s17 = scalar_lea.vmem %s1003_s3, %s664_s23 }
   0xf   : > { %783 = vmatprep.subr.bf16.mxu0 %v854_v1  ;;  %814 = vmatprep.subr.bf16.mxu1 %v854_v1  ;;  %v861_v4 = vld [vmem:[%s948_s26] sm:$0xff]   ;;  %v863_v10 = vld [vmem:[%s948_s26 + $0x8] sm:$0xff]   ;;  %v865_v12 = vld [vmem:[%s948_s26 + $0x10] sm:$0xff]  }
  0x10   : > { %v862_v5 = vld [vmem:[%s948_s26 + $0x20] sm:$0xff]   ;;  %797 = vmatprep.mubr.bf16.mxu0 %v861_v4  ;;  %v864_v11 = vld [vmem:[%s948_s26 + $0x28] sm:$0xff]   ;;  %v866_v13 = vld [vmem:[%s948_s26 + $0x30] sm:$0xff]  }
  0x11   : > { %805 = vmatprep.mubr.bf16.mxu1 %v862_v5  ;;  %v867_v14 = vld [vmem:[%s948_s26 + $0x18] sm:$0xff]   ;;  %v667_v16 = vld [vmem:[%s1002_s2] ss:$0 sm:$0xff] }
  0x12   : > { %784 = vmatpush3.bf16.msra.mxu0 %v854_v1  ;;  %822 = vmatpush3.bf16.msra.mxu1 %v854_v1  ;;  %v868_v15 = vld [vmem:[%s948_s26 + $0x38] sm:$0xff]  }
  0x13   : > { %785 = vmatprep.subr.bf16.mxu0 %v855_v2  ;;  %815 = vmatprep.subr.bf16.mxu1 %v855_v2 }
  0x16   : > { %786 = vmatpush3.bf16.msra.mxu0 %v855_v2  ;;  %823 = vmatpush3.bf16.msra.mxu1 %v855_v2 }
  0x17   : > { %787 = vmatprep.subr.bf16.mxu0 %v856_v3  ;;  %816 = vmatprep.subr.bf16.mxu1 %v856_v3 }
  0x1a   : > { %788 = vmatpush3.bf16.msra.mxu0 %v856_v3  ;;  %824 = vmatpush3.bf16.msra.mxu1 %v856_v3 }
  0x1b   : > { %789 = vmatprep.subr.bf16.mxu0 %v857_v6  ;;  %817 = vmatprep.subr.bf16.mxu1 %v857_v6 }
  0x1e   : > { %790 = vmatpush3.bf16.msra.mxu0 %v857_v6  ;;  %825 = vmatpush3.bf16.msra.mxu1 %v857_v6 }
  0x1f   : > { %791 = vmatprep.subr.bf16.mxu0 %v858_v7  ;;  %818 = vmatprep.subr.bf16.mxu1 %v858_v7 }
  0x22   : > { %792 = vmatpush3.bf16.msra.mxu0 %v858_v7  ;;  %826 = vmatpush3.bf16.msra.mxu1 %v858_v7 }
  0x23   : > { %793 = vmatprep.subr.bf16.mxu0 %v859_v8  ;;  %819 = vmatprep.subr.bf16.mxu1 %v859_v8 }
  0x26   : > { %794 = vmatpush3.bf16.msra.mxu0 %v859_v8  ;;  %827 = vmatpush3.bf16.msra.mxu1 %v859_v8 }
  0x27   : > { %795 = vmatprep.subr.bf16.mxu0 %v860_v9  ;;  %820 = vmatprep.subr.bf16.mxu1 %v860_v9 }
  0x2a   : > { %796 = vmatpush3.bf16.msra.mxu0 %v860_v9  ;;  %828 = vmatpush3.bf16.msra.mxu1 %v860_v9 }
  0x2d   : > { %798 = vmatmul.mubr.bf16.vlgmr.msra.gmra.mxu0 %v863_v10  ;;  %806 = vmatmul.mubr.bf16.vlgmr.msra.gmra.mxu1 %v864_v11 }
  0x2e   : > { %801 = vmatprep.mubr.bf16.mxu0 %v865_v12  ;;  %809 = vmatprep.mubr.bf16.mxu1 %v866_v13 }
  0x35   : > { %802 = vmatmul.mubr.bf16.gmra.mxu0 %v867_v14  ;;  %810 = vmatmul.mubr.bf16.gmra.mxu1 %v868_v15 }
  0xed   : > { %v799_v17 = vpop.f32.mrf.mxu0  ;;  %v807_v18 = vpop.f32.mrf.mxu1 }
  0xee   : > { %v404_v19 = vadd.f32 %v799_v17, %v667_v16  ;;  %v436_v20 = vadd.f32 %v807_v18, %v667_v16 }
  0xef   : > { %v395_v21 = vpop.f32.mrf.mxu0  ;;  %v427_v22 = vpop.f32.mrf.mxu1 }
  0xf0   : > { %v396_v23 = vadd.f32 %v667_v16, %v395_v21  ;;  %v428_v24 = vadd.f32 %v667_v16, %v427_v22  ;;  %v460_v29 = vmax.f32 %v404_v19, 0.0  ;;  %v468_v30 = vmax.f32 %v436_v20, 0.0 }
  0xf1   : > { %v800_v25 = vpop.f32.mrf.mxu0  ;;  %v808_v26 = vpop.f32.mrf.mxu1 }
  0xf2   : > { %v407_v27 = vadd.f32 %v800_v25, %v667_v16  ;;  %v439_v28 = vadd.f32 %v808_v26, %v667_v16  ;;  %v458_v37 = vmax.f32 %v396_v23, 0.0  ;;  %v466_v38 = vmax.f32 %v428_v24, 0.0 }
  0xf3   : > { %v398_v31 = vpop.f32.mrf.mxu0  ;;  %v430_v32 = vpop.f32.mrf.mxu1 }
  0xf4   : > { %v461_v33 = vmax.f32 %v407_v27, 0.0  ;;  %v469_v34 = vmax.f32 %v439_v28, 0.0  ;;  %v399_v35 = vadd.f32 %v667_v16, %v398_v31  ;;  %v431_v36 = vadd.f32 %v667_v16, %v430_v32 }
  0xf5   : > { %v803_v39 = vpop.f32.mrf.mxu0  ;;  %v811_v40 = vpop.f32.mrf.mxu1 }
  0xf6   : > { %v726_v41 = vpack.c.bf16 %v461_v33, %v460_v29  ;;  %v746_v42 = vpack.c.bf16 %v469_v34, %v468_v30  ;;  %v459_v43 = vmax.f32 %v399_v35, 0.0  ;;  %v467_v44 = vmax.f32 %v431_v36, 0.0 }
  0xf7   : > { %v420_v45 = vadd.f32 %v803_v39, %v667_v16  ;;  %v452_v46 = vadd.f32 %v811_v40, %v667_v16  ;;  %v411_v47 = vpop.f32.mrf.mxu0  ;;  %v443_v48 = vpop.f32.mrf.mxu1 }
  0xf8   : > { %758 = vst [vmem:[%s981_s17 + $0x8] sm:$0xff] %v726_v41   ;;  %762 = vst [vmem:[%s981_s17 + $0x28] sm:$0xff] %v746_v42   ;;  %v721_v49 = vpack.c.bf16 %v459_v43, %v458_v37  ;;  %v741_v50 = vpack.c.bf16 %v467_v44, %v466_v38  ;;  %v412_v51 = vadd.f32 %v667_v16, %v411_v47 }
  0xf9   : > { %v444_v52 = vadd.f32 %v667_v16, %v443_v48  ;;  %v804_v53 = vpop.f32.mrf.mxu0  ;;  %v812_v54 = vpop.f32.mrf.mxu1  ;;  %v464_v57 = vmax.f32 %v420_v45, 0.0  ;;  %v472_v58 = vmax.f32 %v452_v46, 0.0 }
  0xfa   : > { %722 = vst [vmem:[%s981_s17] sm:$0xff] %v721_v49   ;;  %761 = vst [vmem:[%s981_s17 + $0x20] sm:$0xff] %v741_v50   ;;  %v423_v55 = vadd.f32 %v804_v53, %v667_v16  ;;  %v455_v56 = vadd.f32 %v812_v54, %v667_v16  ;;  %v462_v1 = vmax.f32 %v412_v51, 0.0 }
  0xfb   : > { %v414_v59 = vpop.f32.mrf.mxu0  ;;  %v446_v60 = vpop.f32.mrf.mxu1  ;;  %v470_v2 = vmax.f32 %v444_v52, 0.0 }
  0xfc   : > { %v465_v61 = vmax.f32 %v423_v55, 0.0  ;;  %v473_v62 = vmax.f32 %v455_v56, 0.0  ;;  %v415_v63 = vadd.f32 %v667_v16, %v414_v59  ;;  %v447_v0 = vadd.f32 %v667_v16, %v446_v60 }
  0xfe   : > { %v736_v3 = vpack.c.bf16 %v465_v61, %v464_v57  ;;  %v756_v4 = vpack.c.bf16 %v473_v62, %v472_v58  ;;  %v463_v5 = vmax.f32 %v415_v63, 0.0  ;;  %v471_v6 = vmax.f32 %v447_v0, 0.0 }
 0x100   : > { %760 = vst [vmem:[%s981_s17 + $0x18] sm:$0xff] %v736_v3   ;;  %764 = vst [vmem:[%s981_s17 + $0x38] sm:$0xff] %v756_v4   ;;  %v731_v7 = vpack.c.bf16 %v463_v5, %v462_v1  ;;  %v751_v8 = vpack.c.bf16 %v471_v6, %v470_v2 }
 0x102   : > { %759 = vst [vmem:[%s981_s17 + $0x10] sm:$0xff] %v731_v7   ;;  %763 = vst [vmem:[%s981_s17 + $0x30] sm:$0xff] %v751_v8  }
 0x103 PF: > { %s13_s14 = sadd.s32 1, %s891_s14   ;;  %s1004_s12 = smov %s887_s13 }
 0x104   : > { %p10_p5 = scmp.ge.s32.totalorder %s13_s14, 6   ;;  %s1005_s13 = smov %s1007_s15 }
 0x106   :  { %12 = sbr.rel (!%p10_p5) target bundleno = 2 (0x2), region = 68 }

// kernel: bottleneck_forward.4
= control target key start
LH: loop header
LB: loop body
LE: loop exit
PB: predicated region body
PF: predicated region fallthrough
CT: control target
= control target key end

     0   :  { %s2409_s12 = smov 0   ;;  %s2913_s0 = inlined_call_operand.vmem [shape: bf16[2,88,512], index: 0, kind: input, shape index: {}]   ;;  %s2914_s1 = inlined_call_operand.vmem [shape: bf16[1152,128], index: 1, kind: input, shape index: {}]   ;;  %s2915_s2 = inlined_call_operand.vmem [shape: f32[1,128], index: 2, kind: input, shape index: {}]   ;;  %s2916_s3 = inlined_call_operand.vmem [shape: bf16[2,72,128], index: 3, kind: output, shape index: {}]  }
   0x1 LB: > { %s1792_s13 = sadd.s32 4294967295, %s2385_s12   ;;  %p1796_p0 = scmp.ge.s32.totalorder %s2385_s12, 1  ;;  %s2385_s12 = sphi %s2409_s12, %s13_s12  }
   0x2   : > { %p137_p1 = scmp.lt.s32.totalorder %s2385_s12, 3 }
   0x4   : > { %p138_p2 = pnand %p1796_p0, %p137_p1 }
   0x5   : > { %p161_p3 = scmp.lt.s32.totalorder (!%p138_p2), %s1792_s13, 1 }
   0x6   : > { %141 = sbr.rel (%p138_p2) target bundleno = 364 (0x16c), region = 32 }
   0xb   : > { %v2257_v0 = vld [vmem:[%s2914_s1 + $0x138] sm:$0xff]   ;;  %v2387_v1 = vmov 0.0   ;;  %vm2388_vm0 = vmmov 0   ;;  %v2260_v4 = vld [vmem:[%s2914_s1 + $0x130] sm:$0xff]   ;;  %v2263_v7 = vld [vmem:[%s2914_s1 + $0x128] sm:$0xff]   ;;  %s2918_s13 = smov (!%p161_p3, %s1792_s13), 1 }
   0xc   : > { %2137 = vmatprep.subr.bf16.mxu0 %v2387_v1  ;;  %v2258_v2 = vld [vmem:[%s2914_s1 + $0x78] sm:$0xff]   ;;  %2153 = vmatprep.mubr.msk.bf16.mxu0 %vm2388_vm0, %v2387_v1  ;;  %v2261_v5 = vld [vmem:[%s2914_s1 + $0x70] sm:$0xff]   ;;  %v2264_v8 = vld [vmem:[%s2914_s1 + $0x68] sm:$0xff]   ;;  %s2245_s23 = smul.u32 176, %s2918_s13  ;;  %vm305_vm1 = vsmask.f32 7424 }
   0xd   : > { %2138 = vmatpush3.bf16.msra.mxu0 %v2257_v0  ;;  %v2259_v3 = vld [vmem:[%s2914_s1 + $0x38] sm:$0xff]   ;;  %1973 = vmatprep.subr.bf16.mxu1 %v2258_v2  ;;  %v2262_v6 = vld [vmem:[%s2914_s1 + $0x30] sm:$0xff]   ;;  %v2265_v9 = vld [vmem:[%s2914_s1 + $0x28] sm:$0xff]   ;;  %vm1522_vm2 = vcmask 1046528   ;;  %s2246_s17 = smul.u32 36, %s2918_s13 }
   0xe   : > { %2139 = vmatprep.subr.bf16.mxu0 %v2387_v1  ;;  %1974 = vmatpush3.bf16.msra.mxu1 %v2259_v3  ;;  %v2266_v10 = vld [vmem:[%s2914_s1 + $0x120] sm:$0xff]   ;;  %v2270_v13 = vld [vmem:[%s2914_s1 + $0x58] sm:$0xff]   ;;  %v2273_v16 = vld [vmem:[%s2914_s1 + $0x50] sm:$0xff]   ;;  %s2498_s7 = scalar_lea.vmem %s2913_s0, %s2245_s23 }
   0xf   : > { %1975 = vmatprep.subr.bf16.mxu1 %v2261_v5  ;;  %v2267_v11 = vld [vmem:[%s2914_s1 + $0x60] sm:$0xff]   ;;  %v2269_v14 = vld [vmem:[%s2914_s1 + $0x118] sm:$0xff]   ;;  %v2272_v17 = vld [vmem:[%s2914_s1 + $0x110] sm:$0xff]   ;;  %s2881_s13 = scalar_lea.vmem %s2916_s3, %s2246_s17 }
  0x10   : > { %v2268_v12 = vld [vmem:[%s2914_s1 + $0x20] sm:$0xff]   ;;  %v2271_v15 = vld [vmem:[%s2914_s1 + $0x18] sm:$0xff]   ;;  %v2274_v18 = vld [vmem:[%s2914_s1 + $0x10] sm:$0xff]  }
  0x11   : > { %2140 = vmatpush3.bf16.msra.mxu0 %v2260_v4  ;;  %v2275_v19 = vld [vmem:[%s2914_s1 + $0x108] sm:$0xff]   ;;  %v2279_v22 = vld [vmem:[%s2914_s1 + $0x40] sm:$0xff]   ;;  %v238_v28 = vld [vmem:[%s2498_s7 + $0x10] sm:$0xff] }
  0x12   : > { %2141 = vmatprep.subr.bf16.mxu0 %v2387_v1  ;;  %1976 = vmatpush3.bf16.msra.mxu1 %v2262_v6  ;;  %v2276_v20 = vld [vmem:[%s2914_s1 + $0x48] sm:$0xff]   ;;  %v2278_v23 = vld [vmem:[%s2914_s1 + $0x100] sm:$0xff]   ;;  %v2285_v32 = vld [vmem:[%s2914_s1 + $0xf8] sm:$0xff]  }
  0x13   : > { %1977 = vmatprep.subr.bf16.mxu1 %v2264_v8  ;;  %v2277_v21 = vld [vmem:[%s2914_s1 + $0x8] sm:$0xff]   ;;  %v2281_v24 = vld [vmem:[%s2498_s7] ss:$16 sps:$4 sm:$0xff]   ;;  %v2286_v36 = vld [vmem:[%s2914_s1 + $0xb8] sm:$0xff]  }
  0x14   : > { %v2282_v25 = vld [vmem:[%s2498_s7 + $0x20] ss:$16 sps:$4 sm:$0xff]   ;;  %v307_v29 = vshrl.u32 %v2281_v24, 16  ;;  %v309_v30 = vshll.u32 %v2281_v24, 16  ;;  %v2289_v41 = vld [vmem:[%s2914_s1 + $0x178] sm:$0xff]   ;;  %v2293_v52 = vld [vmem:[%s2914_s1 + $0xe8] sm:$0xff]  }
  0x15   : > { %2142 = vmatpush3.bf16.msra.mxu0 %v2263_v7  ;;  %v2280_v26 = vld [vmem:[%s2914_s1] sm:$0xff]   ;;  %v314_v31 = vshll.u32 %v2282_v25, 16  ;;  %v2287_v39 = vld [vmem:[%s2914_s1 + $0xf0] sm:$0xff]   ;;  %v318_v40 = vshrl.u32 %v2282_v25, 16  ;;  %v2294_v54 = vld [vmem:[%s2914_s1 + $0xa8] sm:$0xff]  }
  0x16   : > { %2143 = vmatprep.subr.bf16.mxu0 %v2387_v1  ;;  %1978 = vmatpush3.bf16.msra.mxu1 %v2265_v9  ;;  %v236_v27 = vld [vmem:[%s2498_s7] sm:$0xff]  ;;  %v311_v34 = vrot.slane %v309_v30, 1  ;;  %v242_v45 = vld [vmem:[%s2498_s7 + $0x30] sm:$0xff]  ;;  %v2301_v5 = vld [vmem:[%s2914_s1 + $0x168] sm:$0xff]  }
  0x17   : > { %1979 = vmatprep.subr.bf16.mxu1 %v2267_v11  ;;  %v1813_v33 = vcombine.high %v236_v27, %v238_v28  ;;  %v316_v35 = vrot.slane %v314_v31, 1  ;;  %v1812_v38 = vcombine.low %v236_v27, %v238_v28  ;;  %v2290_v43 = vld [vmem:[%s2498_s7 + $0x40] ss:$16 sps:$4 sm:$0xff]   ;;  %v2302_v11 = vld [vmem:[%s2914_s1 + $0xd8] sm:$0xff]  }
  0x18   : > { %v312_v37 = vor.u32 %v311_v34, %v307_v29  ;;  %v240_v44 = vld [vmem:[%s2498_s7 + $0x20] sm:$0xff]  ;;  %v2288_v48 = vld [vmem:[%s2914_s1 + $0xb0] sm:$0xff]   ;;  %v322_v50 = vshll.u32 %v2290_v43, 16  ;;  %v326_v59 = vshrl.u32 %v2290_v43, 16 }
  0x19   : > { %2144 = vmatpush3.bf16.msra.mxu0 %v2266_v10  ;;  %788 = vmatprep.mubr.bf16.mxu1 %v1813_v33  ;;  %v1817_v46 = vcombine.high %v240_v44, %v242_v45  ;;  %v2532_v47 = vcombine.low %v238_v28, %v240_v44  ;;  %v320_v49 = vor.u32 %v318_v40, %v316_v35  ;;  %v2295_v55 = vld [vmem:[%s2914_s1 + $0x170] sm:$0xff]   ;;  %v244_v60 = vld [vmem:[%s2498_s7 + $0x40] sm:$0xff] }
  0x1a   : > { %2145 = vmatprep.subr.bf16.mxu0 %v2387_v1  ;;  %1980 = vmatpush3.bf16.msra.mxu1 %v2268_v12  ;;  %v317_v42 = vsel %vm305_vm1, %v312_v37, %v316_v35  ;;  %v1878_v51 = vcombine.high %v238_v28, %v240_v44  ;;  %v324_v53 = vrot.slane %v322_v50, 1  ;;  %v2297_v56 = vld [vmem:[%s2498_s7 + $0x60] ss:$16 sps:$4 sm:$0xff]   ;;  %v1816_v58 = vcombine.low %v240_v44, %v242_v45  ;;  %v2310_v28 = vld [vmem:[%s2914_s1 + $0x158] sm:$0xff]   ;;  %v2311_v35 = vld [vmem:[%s2914_s1 + $0xc8] sm:$0xff]  }
  0x1b   : > { %1981 = vmatprep.subr.bf16.mxu1 %v2270_v13  ;;  %v246_v61 = vld [vmem:[%s2498_s7 + $0x50] sm:$0xff]  ;;  %v2296_v63 = vld [vmem:[%s2914_s1 + $0xe0] sm:$0xff]   ;;  %v330_v0 = vshll.u32 %v2297_v56, 16  ;;  %v2556_v2 = vcombine.low %v242_v45, %v244_v60  ;;  %v2564_v6 = vcombine.high %v242_v45, %v244_v60  ;;  %v334_v9 = vshrl.u32 %v2297_v56, 16 }
  0x1c   : > { %v325_v57 = vsel %vm305_vm1, %v320_v49, %v324_v53  ;;  %v1221_v62 = vshll.u32 %v1878_v51, 16  ;;  %v1821_v3 = vcombine.high %v244_v60, %v246_v61  ;;  %v2299_v4 = vld [vmem:[%s2914_s1 + $0xa0] sm:$0xff]   ;;  %v1219_v7 = vshrl.u32 %v1878_v51, 16  ;;  %v2309_v30 = vld [vmem:[%s2914_s1 + $0x90] sm:$0xff]  }
  0x1d   : > { %2146 = vmatpush3.bf16.msra.mxu0 %v2269_v14  ;;  %v332_v8 = vrot.slane %v330_v0, 1  ;;  %v328_v10 = vor.u32 %v326_v59, %v324_v53  ;;  %v2304_v13 = vld [vmem:[%s2914_s1 + $0x160] sm:$0xff]   ;;  %v1226_v14 = vshll.u32 %v2564_v6, 16  ;;  %v1209_v33 = vshll.u32 %v2532_v47, 16  ;;  %v2316_v53 = vld [vmem:[%s2914_s1 + $0x148] sm:$0xff]  }
  0x1e   : > { %2147 = vmatprep.subr.bf16.mxu0 %v2387_v1  ;;  %1982 = vmatpush3.bf16.msra.mxu1 %v2271_v15  ;;  %v1223_v12 = vrot.slane %v1221_v62, 1  ;;  %v2577_v15 = vld [vmem:[%s2498_s7 + $0x80] ss:$16 sps:$4 sm:$0x1f]   ;;  %v1214_v37 = vshll.u32 %v2556_v2, 16  ;;  %v1230_v50 = vshrl.u32 %v2556_v2, 16 }
  0x1f   : > { %1983 = vmatprep.subr.bf16.mxu1 %v2273_v16  ;;  %v248_v16 = vld [vmem:[%s2498_s7 + $0x60] sm:$0xff]  ;;  %v338_v24 = vshll.u32 %v2577_v15, 16  ;;  %v336_v31 = vor.u32 %v334_v9, %v332_v8  ;;  %v1211_v40 = vrot.slane %v1209_v33, 1  ;;  %v2324_v62 = vld [vmem:[%s2498_s7 + $0x8] ss:$16 sps:$4 sm:$0xff]  }
  0x20   : > { %v2607_v34 = vcombine.high %v246_v61, %v248_v16  ;;  %v2323_v2 = vld [vmem:[%s2914_s1 + $0x1f8] sm:$0xff]   ;;  %v952_v9 = vshrl.u32 %v2324_v62, 16 }
  0x21   : > { %2148 = vmatpush3.bf16.msra.mxu0 %v2272_v17  ;;  %v1224_v17 = vor.u32 %v1223_v12, %v1219_v7  ;;  %v340_v29 = vrot.slane %v338_v24, 1 }
  0x22   : > { %2149 = vmatprep.subr.bf16.mxu0 %v2387_v1  ;;  %1984 = vmatpush3.bf16.msra.mxu1 %v2274_v18  ;;  %v2582_v18 = vld [vmem:[%s2498_s7 + $0x70] sm:$0xff]  ;;  %v1254_v7 = vshrl.u32 %v2607_v34, 16 }
  0x23   : > { %1985 = vmatprep.subr.bf16.mxu1 %v2276_v20  ;;  %v2584_v20 = vcombine.low %v246_v61, %v248_v16  ;;  %v1825_v25 = vcombine.high %v248_v16, %v2582_v18  ;;  %v341_v44 = vsel %vm305_vm1, %v336_v31, %v340_v29 }
  0x25   : > { %2150 = vmatpush3.bf16.msra.mxu0 %v2275_v19  ;;  %v1228_v19 = vrot.slane %v1226_v14, 1  ;;  %v1234_v51 = vshll.u32 %v2584_v20, 16  ;;  %v2333_v14 = vld [vmem:[%s2498_s7 + $0x48] ss:$16 sps:$4 sm:$0xff]  }
  0x26   : > { %2151 = vmatprep.subr.bf16.mxu0 %v2387_v1  ;;  %1986 = vmatpush3.bf16.msra.mxu1 %v2277_v21  ;;  %v333_v21 = vsel %vm305_vm1, %v328_v10, %v332_v8  ;;  %v967_v24 = vshll.u32 %v2333_v14, 16 }
  0x27   : > { %1987 = vmatprep.subr.bf16.mxu1 %v2279_v22  ;;  %v1820_v22 = vcombine.low %v244_v60, %v246_v61  ;;  %v2596_v27 = vsel %vm305_vm1, %v1224_v17, %v1228_v19  ;;  %v1236_v59 = vrot.slane %v1234_v51, 1  ;;  %v2319_v60 = vld [vmem:[%s2914_s1 + $0x140] sm:$0xff]  }
  0x28   : > { %v969_v33 = vrot.slane %v967_v24, 1  ;;  %v2368_v24 = vld [vmem:[%s2498_s7 + $0x30] ss:$16 sps:$4 sm:$0xff]  }
  0x29   : > { %2152 = vmatpush3.bf16.msra.mxu0 %v2278_v23  ;;  %v2303_v23 = vld [vmem:[%s2914_s1 + $0x98] sm:$0xff]  }
  0x2a   : > { %2019 = vmatprep.subr.bf16.mxu0 %v2285_v32  ;;  %1988 = vmatpush3.bf16.msra.mxu1 %v2280_v26  ;;  %v2308_v26 = vld [vmem:[%s2914_s1 + $0xd0] sm:$0xff]   ;;  %v1207_v32 = vshrl.u32 %v2532_v47, 16  ;;  %v1242_v47 = vshll.u32 %v2607_v34, 16 }
  0x2b   : > { %2173 = vmatprep.subr.bf16.mxu1 %v2387_v1 }
  0x2c   : > { %2154 = vmatmul.mubr.bf16.vlgmr.msra.gmra.mxu0 %v317_v42  ;;  %v1216_v42 = vrot.slane %v1214_v37, 1  ;;  %v1212_v45 = vor.u32 %v1211_v40, %v1207_v32  ;;  %v1244_v56 = vrot.slane %v1242_v47, 1  ;;  %v2334_v32 = vld [vmem:[%s2914_s1 + $0x1e8] sm:$0xff]  }
  0x2d   : > { %789 = vmatmul.mubr.bf16.vlgmr.msra.gmra.mxu1 %v1812_v38  ;;  %2020 = vmatpush3.bf16.msra.mxu0 %v2286_v36  ;;  %v2312_v36 = vld [vmem:[%s2914_s1 + $0x150] sm:$0xff]   ;;  %v1238_v38 = vshrl.u32 %v2564_v6, 16  ;;  %v2342_v37 = vld [vmem:[%s2498_s7 + $0x68] ss:$16 sps:$4 sm:$0xff]  }
  0x2e   : > { %2021 = vmatprep.subr.bf16.mxu0 %v2287_v39  ;;  %2157 = vmatprep.mubr.msk.bf16.mxu0 %vm2388_vm0, %v2387_v1  ;;  %v252_v39 = vld [vmem:[%s2498_s7 + $0x80] sm:$0xff]  ;;  %v1256_v12 = vor.u32 %v1254_v7, %v1244_v56  ;;  %v2335_v40 = vld [vmem:[%s2914_s1 + $0x1a8] sm:$0xff]  }
  0x2f   : > { %2174 = vmatpush3.bf16.msra.mxu1 %v2289_v41  ;;  %796 = vmatprep.mubr.bf16.mxu1 %v1817_v46  ;;  %v1824_v41 = vcombine.low %v248_v16, %v2582_v18  ;;  %v2623_v43 = vcombine.low %v2582_v18, %v252_v39  ;;  %v1240_v46 = vor.u32 %v1238_v38, %v1228_v19  ;;  %v2326_v19 = vld [vmem:[%s2914_s1 + $0x1b8] sm:$0xff]   ;;  %v2336_v38 = vld [vmem:[%s2914_s1 + $0x230] sm:$0xff]   ;;  %v2343_v47 = vld [vmem:[%s2914_s1 + $0x228] sm:$0xff]  }
  0x30   : > { %2175 = vmatprep.subr.bf16.mxu1 %v2387_v1  ;;  %v1829_v49 = vcombine.high %v252_v39, %v252_v39  ;;  %v2665_v6 = vcombine.high %v2582_v18, %v252_v39  ;;  %v1828_v8 = vcombine.low %v252_v39, %v252_v39  ;;  %v2320_v18 = vld [vmem:[%s2498_s7 + $0x8] ss:$16 sps:$4 sm:$0xff]  }
  0x31   : > { %2022 = vmatpush3.bf16.msra.mxu0 %v2288_v48  ;;  %v2313_v48 = vld [vmem:[%s2914_s1 + $0x88] sm:$0xff]   ;;  %v2652_v61 = vsel %vm305_vm1, %v1240_v46, %v1244_v56  ;;  %v975_v46 = vshll.u32 %v2342_v37, 16 }
  0x32   : > { %2023 = vmatprep.subr.bf16.mxu0 %v2293_v52  ;;  %v342_v52 = vshrl.u32 %v2577_v15, 16  ;;  %v2347_v56 = vld [vmem:[%s2498_s7 + $0x6c] ss:$16 sps:$4 sm:$0xff]  }
  0x33   : > { %2176 = vmatpush3.bf16.msra.mxu1 %v2295_v55  ;;  %v2640_v55 = vsel %vm305_vm1, %v1212_v45, %v1216_v42  ;;  %v2339_v45 = vld [vmem:[%s2914_s1 + $0x1e0] sm:$0xff]   ;;  %v977_v51 = vrot.slane %v975_v46, 1 }
  0x34   : > { %2158 = vmatmul.mubr.bf16.gmra.mxu0 %v325_v57  ;;  %2177 = vmatprep.subr.bf16.mxu1 %v2387_v1  ;;  %v2318_v57 = vld [vmem:[%s2914_s1 + $0x80] sm:$0xff]  }
  0x35   : > { %797 = vmatmul.mubr.bf16.gmra.mxu1 %v1816_v58  ;;  %2024 = vmatpush3.bf16.msra.mxu0 %v2294_v54  ;;  %v2317_v54 = vld [vmem:[%s2914_s1 + $0xc0] sm:$0xff]   ;;  %v1232_v58 = vor.u32 %v1230_v50, %v1216_v42  ;;  %v971_v42 = vshrl.u32 %v2333_v14, 16 }
  0x36   : > { %2161 = vmatprep.mubr.msk.bf16.mxu0 %vm2388_vm0, %v2387_v1  ;;  %2025 = vmatprep.subr.bf16.mxu0 %v2296_v63  ;;  %v2325_v63 = vld [vmem:[%s2498_s7 + $0x28] ss:$16 sps:$4 sm:$0xff]   ;;  %v2360_v14 = vld [vmem:[%s2914_s1 + $0x1c0] sm:$0xff]  }
  0x37   : > { %804 = vmatprep.mubr.bf16.mxu1 %v1821_v3  ;;  %2178 = vmatpush3.bf16.msra.mxu1 %v2301_v5  ;;  %v2657_v0 = vsel %vm305_vm1, %v1232_v58, %v1236_v59  ;;  %v344_v3 = vor.u32 %v342_v52, %v340_v29  ;;  %v954_v5 = vshll.u32 %v2324_v62, 16  ;;  %v1250_v29 = vshll.u32 %v2623_v43, 16  ;;  %v2344_v52 = vld [vmem:[%s2914_s1 + $0x1d8] sm:$0xff]   ;;  %v2351_v62 = vld [vmem:[%s2914_s1 + $0x1d0] sm:$0xff]  }
  0x38   : > { %2179 = vmatprep.subr.bf16.mxu1 %v2387_v1  ;;  %v973_v50 = vor.u32 %v971_v42, %v969_v33 }
  0x39   : > { %2026 = vmatpush3.bf16.msra.mxu0 %v2299_v4  ;;  %v2322_v4 = vld [vmem:[%s2498_s7 + $0xc] ss:$16 sps:$4 sm:$0xff]   ;;  %v956_v10 = vrot.slane %v954_v5, 1  ;;  %v2699_v34 = vrot.slane %v1250_v29, 1  ;;  %v2371_v29 = vld [vmem:[%s2498_s7 + $0x50] ss:$16 sps:$4 sm:$0xff]  }
  0x3a   : > { %2027 = vmatprep.subr.bf16.mxu0 %v2302_v11  ;;  %v959_v11 = vshll.u32 %v2325_v63, 16  ;;  %v253_v5 = vld [vmem:[%s2498_s7 + $0x88] sm:$0xff] }
  0x3b   : > { %2180 = vmatpush3.bf16.msra.mxu1 %v2304_v13  ;;  %v1258_v13 = vshll.u32 %v2665_v6, 16  ;;  %v957_v15 = vor.u32 %v956_v10, %v952_v9  ;;  %v2349_v9 = vld [vmem:[%s2498_s7 + $0x68] ss:$16 sps:$4 sm:$0xff]   ;;  %v1831_v10 = vcombine.high %v253_v5, %v253_v5 }
  0x3c   : > { %2162 = vmatmul.mubr.bf16.gmra.mxu0 %v333_v21  ;;  %2181 = vmatprep.subr.bf16.mxu1 %v2387_v1  ;;  %v961_v16 = vrot.slane %v959_v11, 1 }
  0x3d   : > { %805 = vmatmul.mubr.bf16.gmra.mxu1 %v1820_v22  ;;  %2028 = vmatpush3.bf16.msra.mxu0 %v2303_v23  ;;  %v2673_v17 = vrot.slane %v1258_v13, 1  ;;  %v1246_v22 = vshrl.u32 %v2584_v20, 16  ;;  %v2327_v23 = vld [vmem:[%s2914_s1 + $0x1f0] sm:$0xff]   ;;  %v2331_v20 = vld [vmem:[%s2914_s1 + $0x238] sm:$0xff]   ;;  %v2359_v13 = vld [vmem:[%s2914_s1 + $0x208] sm:$0xff]  }
  0x3e   : > { %2165 = vmatprep.mubr.msk.bf16.mxu0 %vm2388_vm0, %v2387_v1  ;;  %812 = vmatprep.mubr.bf16.mxu1 %v1825_v25  ;;  %v962_v25 = vsel %vm305_vm1, %v957_v15, %v961_v16 }
  0x3f   : > { %2029 = vmatprep.subr.bf16.mxu0 %v2308_v26  ;;  %2182 = vmatpush3.bf16.msra.mxu1 %v2310_v28  ;;  %v2681_v21 = vsel %vm305_vm1, %v1256_v12, %v2673_v17  ;;  %v2329_v26 = vld [vmem:[%s2498_s7 + $0x2c] ss:$16 sps:$4 sm:$0xff]   ;;  %v963_v28 = vshrl.u32 %v2325_v63, 16  ;;  %v1248_v31 = vor.u32 %v1246_v22, %v1236_v59  ;;  %v978_v59 = vsel %vm305_vm1, %v973_v50, %v977_v51  ;;  %v2352_v63 = vld [vmem:[%s2914_s1 + $0x190] sm:$0xff]  }
  0x40   : > { %2183 = vmatprep.subr.bf16.mxu1 %v2387_v1  ;;  %v2357_v12 = vld [vmem:[%s2914_s1 + $0x188] sm:$0xff]  }
  0x41   : > { %2030 = vmatpush3.bf16.msra.mxu0 %v2309_v30  ;;  %v2328_v30 = vld [vmem:[%s2914_s1 + $0x1b0] sm:$0xff]   ;;  %v2710_v39 = vsel %vm305_vm1, %v1248_v31, %v2699_v34 }
  0x42   : > { %2031 = vmatprep.subr.bf16.mxu0 %v2311_v35  ;;  %v2332_v35 = vld [vmem:[%s2498_s7 + $0x28] ss:$16 sps:$4 sm:$0xff]   ;;  %v2374_v31 = vld [vmem:[%s2498_s7 + $0x70] ss:$16 sps:$4 sm:$0xff]  }
  0x43   : > { %2184 = vmatpush3.bf16.msra.mxu1 %v2312_v36  ;;  %v965_v36 = vor.u32 %v963_v28, %v961_v16  ;;  %v2361_v16 = vld [vmem:[%s2914_s1 + $0x180] sm:$0xff]  }
  0x44   : > { %2166 = vmatmul.mubr.bf16.gmra.mxu0 %v341_v44  ;;  %2185 = vmatprep.subr.bf16.mxu1 %v2387_v1 }
  0x45   : > { %813 = vmatmul.mubr.bf16.gmra.mxu1 %v1824_v41  ;;  %2169 = vmatprep.mubr.msk.bf16.mxu0 %vm2388_vm0, %v2387_v1  ;;  %v2337_v41 = vld [vmem:[%s2498_s7 + $0x4c] ss:$16 sps:$4 sm:$0xff]   ;;  %v970_v44 = vsel %vm305_vm1, %v965_v36, %v969_v33 }
  0x46   : > { %2032 = vmatpush3.bf16.msra.mxu0 %v2313_v48  ;;  %820 = vmatprep.mubr.bf16.mxu1 %v1829_v49  ;;  %v2725_v48 = vld [vmem:[%s2498_s7 + $0x88] ss:$16 sps:$4 sm:$0x1f]   ;;  %v2341_v49 = vld [vmem:[%s2914_s1 + $0x1a0] sm:$0xff]  }
  0x47   : > { %2186 = vmatpush3.bf16.msra.mxu1 %v2316_v53  ;;  %2033 = vmatprep.subr.bf16.mxu0 %v2317_v54  ;;  %v2346_v53 = vld [vmem:[%s2914_s1 + $0x220] sm:$0xff]   ;;  %v2340_v54 = vld [vmem:[%s2498_s7 + $0x48] ss:$16 sps:$4 sm:$0xff]   ;;  %v983_v58 = vshll.u32 %v2725_v48, 16  ;;  %v987_v15 = vshrl.u32 %v2725_v48, 16 }
  0x48   : > { %2187 = vmatprep.subr.bf16.mxu1 %v2387_v1 }
  0x4a   : > { %2034 = vmatpush3.bf16.msra.mxu0 %v2318_v57  ;;  %v2345_v57 = vld [vmem:[%s2914_s1 + $0x198] sm:$0xff]  }
  0x4b   : > { %2188 = vmatpush3.bf16.msra.mxu1 %v2319_v60  ;;  %2078 = vmatprep.subr.bf16.mxu0 %v2323_v2  ;;  %v979_v60 = vshrl.u32 %v2342_v37, 16  ;;  %v2353_v2 = vld [vmem:[%s2914_s1 + $0x218] sm:$0xff]   ;;  %v1262_v37 = vshrl.u32 %v2623_v43, 16 }
  0x4c   : > { %2170 = vmatmul.mubr.bf16.gmra.mxu0 %v344_v3  ;;  %2209 = vmatprep.subr.bf16.mxu1 %v2387_v1  ;;  %v2354_v3 = vld [vmem:[%s2914_s1 + $0x1c8] sm:$0xff]  }
  0x4d   : > { %821 = vmatmul.mubr.bf16.gmra.mxu1 %v1828_v8  ;;  %860 = vmatprep.mubr.bf16.mxu0 %v2322_v4  ;;  %v985_v4 = vrot.slane %v983_v58, 1  ;;  %v981_v7 = vor.u32 %v979_v60, %v977_v51  ;;  %v2355_v8 = vld [vmem:[%s2914_s1 + $0x210] sm:$0xff]  }
  0x4e   : > { %2189 = vmatprep.mubr.msk.bf16.mxu1 %vm2388_vm0, %v2387_v1 }
  0x4f   : > { %v986_v11 = vsel %vm305_vm1, %v981_v7, %v985_v4  ;;  %v989_v22 = vor.u32 %v987_v15, %v985_v4 }
  0x54   : > { %861 = vmatmul.mubr.bf16.vlgmr.msra.gmra.mxu0 %v2320_v18  ;;  %v2362_v18 = vld [vmem:[%s2914_s1 + $0x200] sm:$0xff]  }
  0x55   : > { %2190 = vmatmul.mubr.bf16.vlgmr.msra.gmra.mxu1 %v962_v25  ;;  %2079 = vmatpush3.bf16.msra.mxu0 %v2326_v19  ;;  %v1830_v19 = vcombine.low %v253_v5, %v253_v5 }
  0x56   : > { %2080 = vmatprep.subr.bf16.mxu0 %v2327_v23  ;;  %868 = vmatprep.mubr.bf16.mxu0 %v2329_v26  ;;  %v2367_v23 = vld [vmem:[%s2498_s7 + $0x10] ss:$16 sps:$4 sm:$0xfe]   ;;  %v1524_v26 = vrot.slane %v2368_v24, 1 }
  0x57   : > { %2210 = vmatpush3.bf16.msra.mxu1 %v2331_v20  ;;  %2193 = vmatprep.mubr.msk.bf16.mxu1 %vm2388_vm0, %v2387_v1  ;;  %v1523_v25 = vrot.slane %v2367_v23, 1 }
  0x58   : > { %2211 = vmatprep.subr.bf16.mxu1 %v2387_v1 }
  0x59   : > { %2081 = vmatpush3.bf16.msra.mxu0 %v2328_v30  ;;  %v1525_v28 = vsel %vm1522_vm2, %v1523_v25, %v1524_v26  ;;  %v1526_v30 = vrot.slane %v2371_v29, 1 }
  0x5a   : > { %2082 = vmatprep.subr.bf16.mxu0 %v2334_v32  ;;  %v1270_v32 = vshrl.u32 %v2665_v6, 16 }
  0x5b   : > { %2212 = vmatpush3.bf16.msra.mxu1 %v2336_v38  ;;  %v1527_v20 = vsel %vm1522_vm2, %v1524_v26, %v1526_v30 }
  0x5c   : > { %869 = vmatmul.mubr.bf16.gmra.mxu0 %v2332_v35  ;;  %2213 = vmatprep.subr.bf16.mxu1 %v2387_v1  ;;  %v1272_v35 = vor.u32 %v1270_v32, %v2673_v17 }
  0x5d   : > { %2194 = vmatmul.mubr.bf16.gmra.mxu1 %v970_v44  ;;  %2083 = vmatpush3.bf16.msra.mxu0 %v2335_v40 }
  0x5e   : > { %876 = vmatprep.mubr.bf16.mxu0 %v2337_v41  ;;  %2084 = vmatprep.subr.bf16.mxu0 %v2339_v45  ;;  %v2378_v41 = vld [vmem:[%s2498_s7 + $0x90] ss:$16 sps:$4 sm:$0x1f]  }
  0x5f   : > { %2197 = vmatprep.mubr.msk.bf16.mxu1 %vm2388_vm0, %v2387_v1  ;;  %2214 = vmatpush3.bf16.msra.mxu1 %v2343_v47  ;;  %v1530_v17 = vrot.slane %v2378_v41, 1 }
  0x60   : > { %2215 = vmatprep.subr.bf16.mxu1 %v2387_v1 }
  0x61   : > { %2085 = vmatpush3.bf16.msra.mxu0 %v2341_v49 }
  0x62   : > { %2086 = vmatprep.subr.bf16.mxu0 %v2344_v52 }
  0x63   : > { %2216 = vmatpush3.bf16.msra.mxu1 %v2346_v53 }
  0x64   : > { %877 = vmatmul.mubr.bf16.gmra.mxu0 %v2340_v54  ;;  %2217 = vmatprep.subr.bf16.mxu1 %v2387_v1 }
  0x65   : > { %2198 = vmatmul.mubr.bf16.gmra.mxu1 %v978_v59  ;;  %2087 = vmatpush3.bf16.msra.mxu0 %v2345_v57 }
  0x66   : > { %884 = vmatprep.mubr.bf16.mxu0 %v2347_v56  ;;  %2201 = vmatprep.mubr.msk.bf16.mxu1 %vm2388_vm0, %v2387_v1 }
  0x67   : > { %2088 = vmatprep.subr.bf16.mxu0 %v2351_v62  ;;  %2218 = vmatpush3.bf16.msra.mxu1 %v2353_v2 }
  0x68   : > { %2219 = vmatprep.subr.bf16.mxu1 %v2387_v1 }
  0x69   : > { %2089 = vmatpush3.bf16.msra.mxu0 %v2352_v63 }
  0x6a   : > { %2090 = vmatprep.subr.bf16.mxu0 %v2354_v3 }
  0x6b   : > { %2220 = vmatpush3.bf16.msra.mxu1 %v2355_v8 }
  0x6c   : > { %885 = vmatmul.mubr.bf16.gmra.mxu0 %v2349_v9  ;;  %2221 = vmatprep.subr.bf16.mxu1 %v2387_v1 }
  0x6d   : > { %2202 = vmatmul.mubr.bf16.gmra.mxu1 %v986_v11  ;;  %892 = vmatprep.mubr.bf16.mxu0 %v1831_v10 }
  0x6e   : > { %2091 = vmatpush3.bf16.msra.mxu0 %v2357_v12  ;;  %2205 = vmatprep.mubr.msk.bf16.mxu1 %vm2388_vm0, %v2387_v1 }
  0x6f   : > { %2222 = vmatpush3.bf16.msra.mxu1 %v2359_v13  ;;  %2092 = vmatprep.subr.bf16.mxu0 %v2360_v14 }
  0x70   : > { %2223 = vmatprep.subr.bf16.mxu1 %v2387_v1 }
  0x72   : > { %2093 = vmatpush3.bf16.msra.mxu0 %v2361_v16 }
  0x73   : > { %2224 = vmatpush3.bf16.msra.mxu1 %v2362_v18 }
  0x74   : > { %893 = vmatmul.mubr.bf16.gmra.mxu0 %v1830_v19 }
  0x75   : > { %2206 = vmatmul.mubr.bf16.gmra.mxu1 %v989_v22  ;;  %1422 = vmatprep.mubr.bf16.mxu0 %v2596_v27  ;;  %v2375_v27 = vld [vmem:[%s2498_s7 + $0x94] ss:$16 sps:$4 sm:$0x1f]  }
  0x76   : > { %2225 = vmatprep.mubr.msk.bf16.mxu1 %vm2388_vm0, %v2387_v1  ;;  %v1274_v33 = vshll.u32 %v2375_v27, 16  ;;  %v1281_v42 = vshrl.u32 %v2375_v27, 16 }
  0x78   : > { %v1276_v36 = vrot.slane %v1274_v33, 1 }
  0x7a   : > { %v1277_v6 = vsel %vm305_vm1, %v1272_v35, %v1276_v36  ;;  %v1283_v44 = vor.u32 %v1281_v42, %v1276_v36 }
  0x7c   : > { %1423 = vmatmul.mubr.bf16.vlgmr.msra.gmra.mxu0 %v2640_v55  ;;  %v2377_v55 = vld [vmem:[%s2498_s7 + $0x90] ss:$16 sps:$4 sm:$0x1f]  }
  0x7d   : > { %2226 = vmatmul.mubr.bf16.vlgmr.msra.gmra.mxu1 %v1525_v28  ;;  %1430 = vmatprep.mubr.bf16.mxu0 %v2652_v61  ;;  %v1528_v61 = vrot.slane %v2374_v31, 1  ;;  %v1266_v38 = vshll.u32 %v2377_v55, 16  ;;  %v1278_v46 = vshrl.u32 %v2377_v55, 16 }
  0x7e   : > { %2229 = vmatprep.mubr.msk.bf16.mxu1 %vm2388_vm0, %v2387_v1 }
  0x7f   : > { %v1529_v40 = vsel %vm1522_vm2, %v1526_v30, %v1528_v61  ;;  %v1531_v45 = vsel %vm1522_vm2, %v1528_v61, %v1530_v17 }
  0x84   : > { %1431 = vmatmul.mubr.bf16.gmra.mxu0 %v2657_v0  ;;  %v1264_v0 = vor.u32 %v1262_v37, %v2699_v34 }
  0x85   : > { %2230 = vmatmul.mubr.bf16.gmra.mxu1 %v1527_v20  ;;  %1438 = vmatprep.mubr.bf16.mxu0 %v2681_v21  ;;  %v1268_v21 = vrot.slane %v1266_v38, 1 }
  0x86   : > { %2233 = vmatprep.mubr.msk.bf16.mxu1 %vm2388_vm0, %v2387_v1 }
  0x87   : > { %v1269_v43 = vsel %vm305_vm1, %v1264_v0, %v1268_v21 }
  0x8c   : > { %1439 = vmatmul.mubr.bf16.gmra.mxu0 %v2710_v39  ;;  %v1280_v39 = vor.u32 %v1278_v46, %v1268_v21 }
  0x8d   : > { %2234 = vmatmul.mubr.bf16.gmra.mxu1 %v1529_v40  ;;  %1446 = vmatprep.mubr.bf16.mxu0 %v1277_v6 }
  0x8e   : > { %2237 = vmatprep.mubr.msk.bf16.mxu1 %vm2388_vm0, %v2387_v1 }
  0x94   : > { %1447 = vmatmul.mubr.bf16.gmra.mxu0 %v1269_v43 }
  0x95   : > { %2238 = vmatmul.mubr.bf16.gmra.mxu1 %v1531_v45  ;;  %1454 = vmatprep.mubr.bf16.mxu0 %v1283_v44 }
  0x96   : > { %2241 = vmatprep.mubr.msk.bf16.mxu1 %vm2388_vm0, %v2387_v1 }
  0x9c   : > { %1455 = vmatmul.mubr.bf16.gmra.mxu0 %v1280_v39 }
  0x9d   : > { %2242 = vmatmul.mubr.bf16.gmra.mxu1 %v1530_v17 }
  0xec   : > { %v432_v34 = vpop.f32.mrf.mxu0 }
  0xed   : > { %v1989_v47 = vpop.f32.mrf.mxu1 }
  0xee   : > { %v2155_v48 = vpop.f32.mrf.mxu0 }
  0xef   : > { %v1990_v49 = vpop.f32.mrf.mxu1 }
  0xf0   : > { %v1991_v50 = vadd.f32 %v1990_v49, %v1989_v47  ;;  %v435_v51 = vpop.f32.mrf.mxu0 }
  0xf1   : > { %v1992_v52 = vpop.f32.mrf.mxu1 }
  0xf2   : > { %v2822_v53 = vadd.f32 %v1991_v50, %v432_v34  ;;  %v2156_v54 = vpop.f32.mrf.mxu0 }
  0xf3   : > { %v1993_v56 = vpop.f32.mrf.mxu1 }
  0xf4   : > { %v1994_v57 = vadd.f32 %v1993_v56, %v1992_v52  ;;  %v440_v58 = vpop.f32.mrf.mxu0 }
  0xf5   : > { %v1995_v59 = vpop.f32.mrf.mxu1 }
  0xf6   : > { %v2824_v60 = vadd.f32 %v1994_v57, %v435_v51  ;;  %v2159_v1 = vpop.f32.mrf.mxu0 }
  0xf7   : > { %v1996_v62 = vpop.f32.mrf.mxu1 }
  0xf8   : > { %v1997_v63 = vadd.f32 %v1996_v62, %v1995_v59  ;;  %v443_v2 = vpop.f32.mrf.mxu0 }
  0xf9   : > { %v1998_v3 = vpop.f32.mrf.mxu1 }
  0xfa   : > { %v2826_v4 = vadd.f32 %v1997_v63, %v440_v58  ;;  %v2160_v5 = vpop.f32.mrf.mxu0 }
  0xfb   : > { %v1999_v7 = vpop.f32.mrf.mxu1 }
  0xfc   : > { %v2000_v8 = vadd.f32 %v1999_v7, %v1998_v3  ;;  %v448_v9 = vpop.f32.mrf.mxu0 }
  0xfd   : > { %v2001_v10 = vpop.f32.mrf.mxu1 }
  0xfe   : > { %v2828_v11 = vadd.f32 %v2000_v8, %v443_v2  ;;  %v2163_v12 = vpop.f32.mrf.mxu0 }
  0xff   : > { %v2002_v13 = vpop.f32.mrf.mxu1 }
 0x100   : > { %v2003_v14 = vadd.f32 %v2002_v13, %v2001_v10  ;;  %v451_v15 = vpop.f32.mrf.mxu0 }
 0x101   : > { %v2004_v16 = vpop.f32.mrf.mxu1 }
 0x102   : > { %v2830_v18 = vadd.f32 %v2003_v14, %v448_v9  ;;  %v2164_v19 = vpop.f32.mrf.mxu0 }
 0x103   : > { %v2005_v22 = vpop.f32.mrf.mxu1 }
 0x104   : > { %v2006_v23 = vadd.f32 %v2005_v22, %v2004_v16  ;;  %v456_v24 = vpop.f32.mrf.mxu0 }
 0x105   : > { %v2007_v25 = vpop.f32.mrf.mxu1 }
 0x106   : > { %v2832_v26 = vadd.f32 %v2006_v23, %v451_v15  ;;  %v2167_v28 = vpop.f32.mrf.mxu0 }
 0x107   : > { %v2008_v29 = vpop.f32.mrf.mxu1 }
 0x108   : > { %v2009_v30 = vadd.f32 %v2008_v29, %v2007_v25  ;;  %v459_v27 = vpop.f32.mrf.mxu0 }
 0x109   : > { %v2010_v20 = vpop.f32.mrf.mxu1 }
 0x10a   : > { %v2834_v31 = vadd.f32 %v2009_v30, %v456_v24  ;;  %v2168_v32 = vpop.f32.mrf.mxu0 }
 0x10b   : > { %v2011_v33 = vpop.f32.mrf.mxu1 }
 0x10c   : > { %v2012_v55 = vadd.f32 %v2011_v33, %v2010_v20  ;;  %v464_v61 = vpop.f32.mrf.mxu0 }
 0x10d   : > { %v2013_v35 = vpop.f32.mrf.mxu1 }
 0x10e   : > { %v2836_v36 = vadd.f32 %v2012_v55, %v459_v27  ;;  %v2171_v37 = vpop.f32.mrf.mxu0 }
 0x10f   : > { %v2014_v38 = vpop.f32.mrf.mxu1 }
 0x110   : > { %v2015_v40 = vadd.f32 %v2014_v38, %v2013_v35  ;;  %v467_v6 = vpop.f32.mrf.mxu0 }
 0x111   : > { %v2016_v41 = vpop.f32.mrf.mxu1 }
 0x112   : > { %v2838_v0 = vadd.f32 %v2015_v40, %v464_v61  ;;  %v2172_v21 = vpop.f32.mrf.mxu0 }
 0x113   : > { %v2017_v42 = vpop.f32.mrf.mxu1 }
 0x114   : > { %v2035_v17 = vpop.f32.mrf.mxu0 }
 0x115   : > { %v1077_v43 = vpop.f32.mrf.mxu1 }
 0x116   : > { %v2036_v44 = vpop.f32.mrf.mxu0 }
 0x117   : > { %v2191_v45 = vpop.f32.mrf.mxu1  ;;  %v2037_v23 = vadd.f32 %v2036_v44, %v2035_v17 }
 0x118   : > { %v2038_v46 = vpop.f32.mrf.mxu0 }
 0x119   : > { %v1080_v39 = vpop.f32.mrf.mxu1  ;;  %v863_v30 = vadd.f32 %v2037_v23, %v2822_v53 }
 0x11a   : > { %v2039_v34 = vpop.f32.mrf.mxu0 }
 0x11b   : > { %v2192_v47 = vpop.f32.mrf.mxu1  ;;  %v2040_v27 = vadd.f32 %v2039_v34, %v2038_v46  ;;  %v1115_v37 = vadd.f32 %v1077_v43, %v863_v30 }
 0x11c   : > { %v2041_v48 = vpop.f32.mrf.mxu0 }
 0x11d   : > { %v1085_v49 = vpop.f32.mrf.mxu1  ;;  %v866_v61 = vadd.f32 %v2040_v27, %v2824_v60  ;;  %v2870_v60 = vld [vmem:[%s2915_s2] ss:$0 sm:$0xff] }
 0x11e   : > { %v2042_v50 = vpop.f32.mrf.mxu0 }
 0x11f   : > { %v2195_v51 = vpop.f32.mrf.mxu1  ;;  %v2043_v35 = vadd.f32 %v2042_v50, %v2041_v48  ;;  %v1116_v53 = vadd.f32 %v1080_v39, %v866_v61 }
 0x120   : > { %v2044_v52 = vpop.f32.mrf.mxu0 }
 0x121   : > { %v2840_v54 = vpop.f32.mrf.mxu1  ;;  %v871_v44 = vadd.f32 %v2043_v35, %v2826_v4 }
 0x122   : > { %v2045_v56 = vpop.f32.mrf.mxu0 }
 0x123   : > { %v2196_v57 = vpop.f32.mrf.mxu1  ;;  %v2046_v42 = vadd.f32 %v2045_v56, %v2044_v52 }
 0x124   : > { %v2047_v58 = vpop.f32.mrf.mxu0  ;;  %v1117_v57 = vadd.f32 %v1085_v49, %v871_v44 }
 0x125   : > { %v2842_v59 = vpop.f32.mrf.mxu1  ;;  %v874_v50 = vadd.f32 %v2046_v42, %v2828_v11 }
 0x126   : > { %v2048_v1 = vpop.f32.mrf.mxu0 }
 0x127   : > { %v2199_v62 = vpop.f32.mrf.mxu1  ;;  %v2049_v51 = vadd.f32 %v2048_v1, %v2047_v58 }
 0x128   : > { %v2050_v63 = vpop.f32.mrf.mxu0 }
 0x129   : > { %v2844_v2 = vpop.f32.mrf.mxu1 }
 0x12a   : > { %v2051_v3 = vpop.f32.mrf.mxu0 }
 0x12b   : > { %v2200_v5 = vpop.f32.mrf.mxu1 }
 0x12c   : > { %v2846_v7 = vpop.f32.mrf.mxu0 }
 0x12d   : > { %v2848_v8 = vpop.f32.mrf.mxu1 }
 0x12e   : > { %v2850_v9 = vpop.f32.mrf.mxu0 }
 0x12f   : > { %v2203_v10 = vpop.f32.mrf.mxu1 }
 0x130   : > { %v2852_v12 = vpop.f32.mrf.mxu0 }
 0x131   : > { %v2854_v13 = vpop.f32.mrf.mxu1 }
 0x132   : > { %v2856_v14 = vpop.f32.mrf.mxu0 }
 0x133   : > { %v2204_v15 = vpop.f32.mrf.mxu1 }
 0x134   : > { %v2858_v16 = vpop.f32.mrf.mxu0 }
 0x135   : > { %v2860_v19 = vpop.f32.mrf.mxu1 }
 0x136   : > { %v2862_v22 = vpop.f32.mrf.mxu0 }
 0x137   : > { %v2207_v24 = vpop.f32.mrf.mxu1 }
 0x138   : > { %v2062_v25 = vpop.f32.mrf.mxu0  ;;  %v879_v24 = vadd.f32 %v2049_v51, %v2830_v18 }
 0x139   : > { %v1112_v28 = vpop.f32.mrf.mxu1  ;;  %v2052_v25 = vadd.f32 %v2051_v3, %v2050_v63 }
 0x13a   : > { %v2063_v29 = vpop.f32.mrf.mxu0  ;;  %v1118_v28 = vadd.f32 %v2840_v54, %v874_v50  ;;  %v2055_v54 = vadd.f32 %v2850_v9, %v2846_v7  ;;  %v1119_v61 = vadd.f32 %v2842_v59, %v879_v24 }
 0x13b   : > { %v2208_v20 = vpop.f32.mrf.mxu1  ;;  %v882_v18 = vadd.f32 %v2052_v25, %v2832_v26  ;;  %v2058_v26 = vadd.f32 %v2856_v14, %v2852_v12 }
 0x13c   : > { %v2094_v32 = vpop.f32.mrf.mxu0 }
 0x13d   : > { %v1619_v33 = vpop.f32.mrf.mxu1  ;;  %v1120_v7 = vadd.f32 %v2844_v2, %v882_v18 }
 0x13e   : > { %v2095_v55 = vpop.f32.mrf.mxu0 }
 0x13f   : > { %v2096_v38 = vadd.f32 %v2095_v55, %v2094_v32  ;;  %v2227_v40 = vpop.f32.mrf.mxu1 }
 0x140   : > { %v2097_v6 = vpop.f32.mrf.mxu0 }
 0x141   : > { %v1462_v41 = vadd.f32 %v2096_v38, %v1115_v37  ;;  %v1622_v21 = vpop.f32.mrf.mxu1 }
 0x142   : > { %v2098_v17 = vpop.f32.mrf.mxu0 }
 0x143   : > { %v1657_v45 = vadd.f32 %v1619_v33, %v1462_v41  ;;  %v2099_v46 = vadd.f32 %v2098_v17, %v2097_v6  ;;  %v2228_v34 = vpop.f32.mrf.mxu1 }
 0x144   : > { %v2100_v43 = vpop.f32.mrf.mxu0 }
 0x145   : > { %v1463_v47 = vadd.f32 %v2099_v46, %v1116_v53  ;;  %v1627_v48 = vpop.f32.mrf.mxu1  ;;  %v1673_v56 = vadd.f32 %v2870_v60, %v1657_v45 }
 0x146   : > { %v2101_v52 = vpop.f32.mrf.mxu0 }
 0x147   : > { %v1658_v4 = vadd.f32 %v1622_v21, %v1463_v47  ;;  %v2102_v62 = vadd.f32 %v2101_v52, %v2100_v43  ;;  %v2231_v39 = vpop.f32.mrf.mxu1  ;;  %v1682_v58 = vmax.f32 %v1673_v56, 0.0  ;;  %v887_v21 = vadd.f32 %v2055_v54, %v2834_v31 }
 0x148   : > { %v2103_v5 = vpop.f32.mrf.mxu0  ;;  %v890_v47 = vadd.f32 %v2058_v26, %v2836_v36  ;;  %v2061_v31 = vadd.f32 %v2862_v22, %v2858_v16 }
 0x149   : > { %v1674_v10 = vadd.f32 %v2870_v60, %v1658_v4  ;;  %v1464_v15 = vadd.f32 %v2102_v62, %v1117_v57  ;;  %v1630_v23 = vpop.f32.mrf.mxu1  ;;  %v1121_v14 = vadd.f32 %v2848_v8, %v887_v21 }
 0x14a   : > { %v2104_v11 = vpop.f32.mrf.mxu0  ;;  %v895_v36 = vadd.f32 %v2061_v31, %v2838_v0  ;;  %v1122_v62 = vadd.f32 %v2854_v13, %v890_v47 }
 0x14b   : > { %v1683_v1 = vmax.f32 %v1674_v10, 0.0  ;;  %v1659_v29 = vadd.f32 %v1627_v48, %v1464_v15  ;;  %v2105_v30 = vadd.f32 %v2104_v11, %v2103_v5  ;;  %v2232_v27 = vpop.f32.mrf.mxu1 }
 0x14c   : > { %v2106_v49 = vpop.f32.mrf.mxu0  ;;  %v1123_v0 = vadd.f32 %v2860_v19, %v895_v36 }
 0x14d   : > { %v1940_v20 = vpack.c.bf16 %v1683_v1, %v1682_v58  ;;  %v1465_v32 = vadd.f32 %v2105_v30, %v1118_v28  ;;  %v1635_v33 = vpop.f32.mrf.mxu1  ;;  %v1675_v3 = vadd.f32 %v2870_v60, %v1659_v29 }
 0x14e   : > { %v2107_v63 = vpop.f32.mrf.mxu0 }
 0x14f   : > { %1941 = vst [vmem:[%s2881_s13] sm:$0xff] %v1940_v20   ;;  %v1660_v55 = vadd.f32 %v1630_v23, %v1465_v32  ;;  %v2108_v35 = vadd.f32 %v2107_v63, %v2106_v49  ;;  %v2235_v37 = vpop.f32.mrf.mxu1  ;;  %v1684_v42 = vmax.f32 %v1675_v3, 0.0 }
 0x150   : > { %v2109_v38 = vpop.f32.mrf.mxu0 }
 0x151   : > { %v1676_v40 = vadd.f32 %v2870_v60, %v1660_v55  ;;  %v1466_v6 = vadd.f32 %v2108_v35, %v1119_v61  ;;  %v1638_v41 = vpop.f32.mrf.mxu1 }
 0x152   : > { %v2110_v9 = vpop.f32.mrf.mxu0 }
 0x153   : > { %v1685_v17 = vmax.f32 %v1676_v40, 0.0  ;;  %v1661_v44 = vadd.f32 %v1635_v33, %v1466_v6  ;;  %v2111_v59 = vadd.f32 %v2110_v9, %v2109_v38  ;;  %v2236_v45 = vpop.f32.mrf.mxu1 }
 0x154   : > { %v2112_v53 = vpop.f32.mrf.mxu0 }
 0x155   : > { %v1945_v46 = vpack.c.bf16 %v1685_v17, %v1684_v42  ;;  %v1467_v34 = vadd.f32 %v2111_v59, %v1120_v7  ;;  %v1643_v43 = vpop.f32.mrf.mxu1  ;;  %v1677_v12 = vadd.f32 %v2870_v60, %v1661_v44 }
 0x156   : > { %v2113_v48 = vpop.f32.mrf.mxu0 }
 0x157   : > { %1957 = vst [vmem:[%s2881_s13 + $0x8] sm:$0xff] %v1945_v46   ;;  %v1662_v2 = vadd.f32 %v1638_v41, %v1467_v34  ;;  %v2114_v50 = vadd.f32 %v2113_v48, %v2112_v53  ;;  %v2239_v51 = vpop.f32.mrf.mxu1  ;;  %v1686_v22 = vmax.f32 %v1677_v12, 0.0 }
 0x158   : > { %v2115_v52 = vpop.f32.mrf.mxu0 }
 0x159   : > { %v1678_v56 = vadd.f32 %v2870_v60, %v1662_v2  ;;  %v1468_v4 = vadd.f32 %v2114_v50, %v1121_v14  ;;  %v1646_v57 = vpop.f32.mrf.mxu1 }
 0x15a   : > { %v2116_v16 = vpop.f32.mrf.mxu0 }
 0x15b   : > { %v1687_v39 = vmax.f32 %v1678_v56, 0.0  ;;  %v1663_v5 = vadd.f32 %v1643_v43, %v1468_v4  ;;  %v2117_v10 = vadd.f32 %v2116_v16, %v2115_v52  ;;  %v2240_v15 = vpop.f32.mrf.mxu1 }
 0x15c   : > { %v2118_v23 = vpop.f32.mrf.mxu0 }
 0x15d   : > { %v1950_v8 = vpack.c.bf16 %v1687_v39, %v1686_v22  ;;  %v1469_v24 = vadd.f32 %v2117_v10, %v1122_v62  ;;  %v1651_v25 = vpop.f32.mrf.mxu1  ;;  %v1679_v11 = vadd.f32 %v2870_v60, %v1663_v5 }
 0x15e   : > { %v2119_v28 = vpop.f32.mrf.mxu0 }
 0x15f   : > { %1958 = vst [vmem:[%s2881_s13 + $0x10] sm:$0xff] %v1950_v8   ;;  %v1664_v58 = vadd.f32 %v1646_v57, %v1469_v24  ;;  %v2120_v1 = vadd.f32 %v2119_v28, %v2118_v23  ;;  %v2243_v13 = vpop.f32.mrf.mxu1  ;;  %v1688_v32 = vmax.f32 %v1679_v11, 0.0 }
 0x160   : > { %v2121_v29 = vpop.f32.mrf.mxu0 }
 0x161   : > { %v1680_v30 = vadd.f32 %v2870_v60, %v1664_v58  ;;  %v1470_v27 = vadd.f32 %v2120_v1, %v1123_v0  ;;  %v1654_v49 = vpop.f32.mrf.mxu1 }
 0x162   : > { %v2122_v20 = vpop.f32.mrf.mxu0 }
 0x163   : > { %v1689_v33 = vmax.f32 %v1680_v30, 0.0  ;;  %v1665_v18 = vadd.f32 %v1651_v25, %v1470_v27  ;;  %v2244_v54 = vpop.f32.mrf.mxu1 }
 0x165   : > { %v1955_v63 = vpack.c.bf16 %v1689_v33, %v1688_v32  ;;  %v1681_v3 = vadd.f32 %v2870_v60, %v1665_v18 }
 0x167   : > { %1959 = vst [vmem:[%s2881_s13 + $0x18] sm:$0xff] %v1955_v63   ;;  %v1690_v55 = vmax.f32 %v1681_v3, 0.0 }
 0x169   : > { %v1936_v61 = vpack.c.bf16 %v1690_v55, %v1690_v55 }
 0x16b   : > { %1736 = vst [vmem:[%s2881_s13 + $0x20] sm:$0xf] %v1936_v61 }
 0x16c PF: > { %s13_s12 = sadd.s32 1, %s2385_s12  }
 0x16d   : > { %p10_p4 = scmp.ge.s32.totalorder %s13_s12, 4  }
 0x16f   :  { %12 = sbr.rel (!%p10_p4) target bundleno = 1 (0x1), region = 62 }

// kernel: bottleneck_forward.5
= control target key start
LH: loop header
LB: loop body
LE: loop exit
PB: predicated region body
PF: predicated region fallthrough
CT: control target
= control target key end

     0   :  { %v938_v0 = vmov 0.0   ;;  %vm939_vm0 = vmmov 0   ;;  %s1174_s3 = inlined_call_operand.vmem [shape: bf16[128,128], index: 3, kind: input, shape index: {}]   ;;  %s1175_s1 = inlined_call_operand.vmem [shape: bf16[128,128], index: 1, kind: input, shape index: {}]   ;;  %s1176_s2 = inlined_call_operand.vmem [shape: bf16[144,128], index: 2, kind: input, shape index: {}]   ;;  %s1177_s0 = inlined_call_operand.vmem [shape: bf16[144,128], index: 0, kind: input, shape index: {}]   ;;  %s1178_s4 = inlined_call_operand.vmem [shape: f32[1,128], index: 4, kind: input, shape index: {}]   ;;  %s1179_s5 = inlined_call_operand.vmem [shape: bf16[144,128], index: 5, kind: output, shape index: {}]  }
   0x1   :  { %798 = vmatprep.subr.bf16.mxu0 %v938_v0  ;;  %850 = vmatprep.subr.bf16.mxu1 %v938_v0  ;;  %v904_v1 = vld [vmem:[%s1174_s3 + $0x38] sm:$0xff]   ;;  %v906_v3 = vld [vmem:[%s1174_s3 + $0x30] sm:$0xff]   ;;  %v908_v5 = vld [vmem:[%s1174_s3 + $0x28] sm:$0xff]  }
   0x2   :  { %v905_v2 = vld [vmem:[%s1175_s1 + $0x38] sm:$0xff]   ;;  %814 = vmatprep.mubr.msk.bf16.mxu0 %vm939_vm0, %v938_v0  ;;  %866 = vmatprep.mubr.msk.bf16.mxu1 %vm939_vm0, %v938_v0  ;;  %v907_v4 = vld [vmem:[%s1175_s1 + $0x30] sm:$0xff]   ;;  %v909_v6 = vld [vmem:[%s1175_s1 + $0x28] sm:$0xff]  }
   0x3   :  { %799 = vmatpush3.bf16.msra.mxu0 %v904_v1  ;;  %851 = vmatpush3.bf16.msra.mxu1 %v905_v2  ;;  %v910_v7 = vld [vmem:[%s1174_s3 + $0x20] sm:$0xff]   ;;  %v912_v9 = vld [vmem:[%s1174_s3 + $0x18] sm:$0xff]   ;;  %v914_v11 = vld [vmem:[%s1174_s3 + $0x10] sm:$0xff]  }
   0x4   :  { %800 = vmatprep.subr.bf16.mxu0 %v938_v0  ;;  %852 = vmatprep.subr.bf16.mxu1 %v938_v0  ;;  %v911_v8 = vld [vmem:[%s1175_s1 + $0x20] sm:$0xff]   ;;  %v913_v10 = vld [vmem:[%s1175_s1 + $0x18] sm:$0xff]   ;;  %v915_v12 = vld [vmem:[%s1175_s1 + $0x10] sm:$0xff]  }
   0x5   :  { %v916_v13 = vld [vmem:[%s1174_s3 + $0x8] sm:$0xff]   ;;  %v918_v15 = vld [vmem:[%s1174_s3] sm:$0xff]   ;;  %v924_v21 = vld [vmem:[%s1176_s2 + $0x10] sm:$0xff]  }
   0x6   :  { %v917_v14 = vld [vmem:[%s1175_s1 + $0x8] sm:$0xff]   ;;  %v919_v16 = vld [vmem:[%s1175_s1] sm:$0xff]   ;;  %v925_v22 = vld [vmem:[%s1177_s0 + $0x10] sm:$0xff]  }
   0x7   :  { %801 = vmatpush3.bf16.msra.mxu0 %v906_v3  ;;  %853 = vmatpush3.bf16.msra.mxu1 %v907_v4  ;;  %v920_v17 = vld [vmem:[%s1176_s2] sm:$0xff]   ;;  %v922_v19 = vld [vmem:[%s1176_s2 + $0x8] sm:$0xff]   ;;  %v926_v23 = vld [vmem:[%s1176_s2 + $0x18] sm:$0xff]  }
   0x8   :  { %802 = vmatprep.subr.bf16.mxu0 %v938_v0  ;;  %854 = vmatprep.subr.bf16.mxu1 %v938_v0  ;;  %v921_v18 = vld [vmem:[%s1177_s0] sm:$0xff]   ;;  %v923_v20 = vld [vmem:[%s1177_s0 + $0x8] sm:$0xff]   ;;  %v927_v24 = vld [vmem:[%s1177_s0 + $0x18] sm:$0xff]  }
   0x9   :  { %v928_v25 = vld [vmem:[%s1176_s2 + $0x20] sm:$0xff]   ;;  %v930_v27 = vld [vmem:[%s1176_s2 + $0x28] sm:$0xff]   ;;  %v932_v29 = vld [vmem:[%s1176_s2 + $0x30] sm:$0xff]  }
   0xa   :  { %v929_v26 = vld [vmem:[%s1177_s0 + $0x20] sm:$0xff]   ;;  %v931_v28 = vld [vmem:[%s1177_s0 + $0x28] sm:$0xff]   ;;  %v933_v30 = vld [vmem:[%s1177_s0 + $0x30] sm:$0xff]  }
   0xb   :  { %803 = vmatpush3.bf16.msra.mxu0 %v908_v5  ;;  %855 = vmatpush3.bf16.msra.mxu1 %v909_v6  ;;  %v934_v31 = vld [vmem:[%s1176_s2 + $0x38] sm:$0xff]   ;;  %v936_v33 = vld [vmem:[%s1176_s2 + $0x40] sm:$0xff]  }
   0xc   :  { %804 = vmatprep.subr.bf16.mxu0 %v938_v0  ;;  %856 = vmatprep.subr.bf16.mxu1 %v938_v0  ;;  %v935_v32 = vld [vmem:[%s1177_s0 + $0x38] sm:$0xff]   ;;  %v937_v34 = vld [vmem:[%s1177_s0 + $0x40] sm:$0xff]  }
   0xd   :  { %v1127_v39 = vld [vmem:[%s1178_s4] ss:$0 sm:$0xff] }
   0xf   :  { %805 = vmatpush3.bf16.msra.mxu0 %v910_v7  ;;  %857 = vmatpush3.bf16.msra.mxu1 %v911_v8 }
  0x10   :  { %806 = vmatprep.subr.bf16.mxu0 %v938_v0  ;;  %858 = vmatprep.subr.bf16.mxu1 %v938_v0 }
  0x13   :  { %807 = vmatpush3.bf16.msra.mxu0 %v912_v9  ;;  %859 = vmatpush3.bf16.msra.mxu1 %v913_v10 }
  0x14   :  { %808 = vmatprep.subr.bf16.mxu0 %v938_v0  ;;  %860 = vmatprep.subr.bf16.mxu1 %v938_v0 }
  0x17   :  { %809 = vmatpush3.bf16.msra.mxu0 %v914_v11  ;;  %861 = vmatpush3.bf16.msra.mxu1 %v915_v12 }
  0x18   :  { %810 = vmatprep.subr.bf16.mxu0 %v938_v0  ;;  %862 = vmatprep.subr.bf16.mxu1 %v938_v0 }
  0x1b   :  { %811 = vmatpush3.bf16.msra.mxu0 %v916_v13  ;;  %863 = vmatpush3.bf16.msra.mxu1 %v917_v14 }
  0x1c   :  { %812 = vmatprep.subr.bf16.mxu0 %v938_v0  ;;  %864 = vmatprep.subr.bf16.mxu1 %v938_v0 }
  0x1f   :  { %813 = vmatpush3.bf16.msra.mxu0 %v918_v15  ;;  %865 = vmatpush3.bf16.msra.mxu1 %v919_v16 }
  0x22   :  { %815 = vmatmul.mubr.bf16.vlgmr.msra.gmra.mxu0 %v920_v17  ;;  %867 = vmatmul.mubr.bf16.vlgmr.msra.gmra.mxu1 %v921_v18 }
  0x23   :  { %818 = vmatprep.mubr.msk.bf16.mxu0 %vm939_vm0, %v938_v0  ;;  %870 = vmatprep.mubr.msk.bf16.mxu1 %vm939_vm0, %v938_v0 }
  0x2a   :  { %819 = vmatmul.mubr.bf16.gmra.mxu0 %v922_v19  ;;  %871 = vmatmul.mubr.bf16.gmra.mxu1 %v923_v20 }
  0x2b   :  { %822 = vmatprep.mubr.msk.bf16.mxu0 %vm939_vm0, %v938_v0  ;;  %874 = vmatprep.mubr.msk.bf16.mxu1 %vm939_vm0, %v938_v0 }
  0x32   :  { %823 = vmatmul.mubr.bf16.gmra.mxu0 %v924_v21  ;;  %875 = vmatmul.mubr.bf16.gmra.mxu1 %v925_v22 }
  0x33   :  { %826 = vmatprep.mubr.msk.bf16.mxu0 %vm939_vm0, %v938_v0  ;;  %878 = vmatprep.mubr.msk.bf16.mxu1 %vm939_vm0, %v938_v0 }
  0x3a   :  { %827 = vmatmul.mubr.bf16.gmra.mxu0 %v926_v23  ;;  %879 = vmatmul.mubr.bf16.gmra.mxu1 %v927_v24 }
  0x3b   :  { %830 = vmatprep.mubr.msk.bf16.mxu0 %vm939_vm0, %v938_v0  ;;  %882 = vmatprep.mubr.msk.bf16.mxu1 %vm939_vm0, %v938_v0 }
  0x42   :  { %831 = vmatmul.mubr.bf16.gmra.mxu0 %v928_v25  ;;  %883 = vmatmul.mubr.bf16.gmra.mxu1 %v929_v26 }
  0x43   :  { %834 = vmatprep.mubr.msk.bf16.mxu0 %vm939_vm0, %v938_v0  ;;  %886 = vmatprep.mubr.msk.bf16.mxu1 %vm939_vm0, %v938_v0 }
  0x4a   :  { %835 = vmatmul.mubr.bf16.gmra.mxu0 %v930_v27  ;;  %887 = vmatmul.mubr.bf16.gmra.mxu1 %v931_v28 }
  0x4b   :  { %838 = vmatprep.mubr.msk.bf16.mxu0 %vm939_vm0, %v938_v0  ;;  %890 = vmatprep.mubr.msk.bf16.mxu1 %vm939_vm0, %v938_v0 }
  0x52   :  { %839 = vmatmul.mubr.bf16.gmra.mxu0 %v932_v29  ;;  %891 = vmatmul.mubr.bf16.gmra.mxu1 %v933_v30 }
  0x53   :  { %842 = vmatprep.mubr.msk.bf16.mxu0 %vm939_vm0, %v938_v0  ;;  %894 = vmatprep.mubr.msk.bf16.mxu1 %vm939_vm0, %v938_v0 }
  0x5a   :  { %843 = vmatmul.mubr.bf16.gmra.mxu0 %v934_v31  ;;  %895 = vmatmul.mubr.bf16.gmra.mxu1 %v935_v32 }
  0x5b   :  { %846 = vmatprep.mubr.msk.bf16.mxu0 %vm939_vm0, %v938_v0  ;;  %898 = vmatprep.mubr.msk.bf16.mxu1 %vm939_vm0, %v938_v0 }
  0x62   :  { %847 = vmatmul.mubr.bf16.gmra.mxu0 %v936_v33  ;;  %899 = vmatmul.mubr.bf16.gmra.mxu1 %v937_v34 }
  0xe2   :  { %v225_v35 = vpop.f32.mrf.mxu0  ;;  %v432_v36 = vpop.f32.mrf.mxu1 }
  0xe3   :  { %v433_v37 = vadd.f32 %v432_v36, %v225_v35 }
  0xe4   :  { %v816_v38 = vpop.f32.mrf.mxu0  ;;  %v868_v40 = vpop.f32.mrf.mxu1 }
  0xe5   :  { %v510_v43 = vadd.f32 %v1127_v39, %v433_v37 }
  0xe6   :  { %v228_v41 = vpop.f32.mrf.mxu0  ;;  %v435_v42 = vpop.f32.mrf.mxu1 }
  0xe7   :  { %v436_v44 = vadd.f32 %v435_v42, %v228_v41  ;;  %v528_v50 = vmax.f32 %v510_v43, 0.0 }
  0xe8   :  { %v817_v45 = vpop.f32.mrf.mxu0  ;;  %v869_v46 = vpop.f32.mrf.mxu1 }
  0xe9   :  { %v511_v47 = vadd.f32 %v1127_v39, %v436_v44 }
  0xea   :  { %v233_v48 = vpop.f32.mrf.mxu0  ;;  %v440_v49 = vpop.f32.mrf.mxu1 }
  0xeb   :  { %v529_v51 = vmax.f32 %v511_v47, 0.0  ;;  %v441_v52 = vadd.f32 %v440_v49, %v233_v48 }
  0xec   :  { %v820_v53 = vpop.f32.mrf.mxu0  ;;  %v872_v54 = vpop.f32.mrf.mxu1 }
  0xed   :  { %v714_v55 = vpack.c.bf16 %v529_v51, %v528_v50  ;;  %v512_v58 = vadd.f32 %v1127_v39, %v441_v52 }
  0xee   :  { %v236_v56 = vpop.f32.mrf.mxu0  ;;  %v443_v57 = vpop.f32.mrf.mxu1 }
  0xef   :  { %715 = vst [vmem:[%s1179_s5] sm:$0xff] %v714_v55   ;;  %v444_v59 = vadd.f32 %v443_v57, %v236_v56  ;;  %v530_v1 = vmax.f32 %v512_v58, 0.0 }
  0xf0   :  { %v821_v60 = vpop.f32.mrf.mxu0  ;;  %v873_v61 = vpop.f32.mrf.mxu1 }
  0xf1   :  { %v513_v62 = vadd.f32 %v1127_v39, %v444_v59 }
  0xf2   :  { %v241_v63 = vpop.f32.mrf.mxu0  ;;  %v448_v0 = vpop.f32.mrf.mxu1 }
  0xf3   :  { %v531_v2 = vmax.f32 %v513_v62, 0.0  ;;  %v449_v3 = vadd.f32 %v448_v0, %v241_v63 }
  0xf4   :  { %v824_v4 = vpop.f32.mrf.mxu0  ;;  %v876_v5 = vpop.f32.mrf.mxu1 }
  0xf5   :  { %v719_v6 = vpack.c.bf16 %v531_v2, %v530_v1  ;;  %v514_v9 = vadd.f32 %v1127_v39, %v449_v3 }
  0xf6   :  { %v244_v7 = vpop.f32.mrf.mxu0  ;;  %v451_v8 = vpop.f32.mrf.mxu1 }
  0xf7   :  { %756 = vst [vmem:[%s1179_s5 + $0x8] sm:$0xff] %v719_v6   ;;  %v452_v10 = vadd.f32 %v451_v8, %v244_v7  ;;  %v532_v16 = vmax.f32 %v514_v9, 0.0 }
  0xf8   :  { %v825_v11 = vpop.f32.mrf.mxu0  ;;  %v877_v12 = vpop.f32.mrf.mxu1 }
  0xf9   :  { %v515_v13 = vadd.f32 %v1127_v39, %v452_v10 }
  0xfa   :  { %v249_v14 = vpop.f32.mrf.mxu0  ;;  %v456_v15 = vpop.f32.mrf.mxu1 }
  0xfb   :  { %v533_v17 = vmax.f32 %v515_v13, 0.0  ;;  %v457_v18 = vadd.f32 %v456_v15, %v249_v14 }
  0xfc   :  { %v828_v19 = vpop.f32.mrf.mxu0  ;;  %v880_v20 = vpop.f32.mrf.mxu1 }
  0xfd   :  { %v724_v21 = vpack.c.bf16 %v533_v17, %v532_v16  ;;  %v516_v24 = vadd.f32 %v1127_v39, %v457_v18 }
  0xfe   :  { %v252_v22 = vpop.f32.mrf.mxu0  ;;  %v459_v23 = vpop.f32.mrf.mxu1 }
  0xff   :  { %757 = vst [vmem:[%s1179_s5 + $0x10] sm:$0xff] %v724_v21   ;;  %v460_v25 = vadd.f32 %v459_v23, %v252_v22  ;;  %v534_v31 = vmax.f32 %v516_v24, 0.0 }
 0x100   :  { %v829_v26 = vpop.f32.mrf.mxu0  ;;  %v881_v27 = vpop.f32.mrf.mxu1 }
 0x101   :  { %v517_v28 = vadd.f32 %v1127_v39, %v460_v25 }
 0x102   :  { %v257_v29 = vpop.f32.mrf.mxu0  ;;  %v464_v30 = vpop.f32.mrf.mxu1 }
 0x103   :  { %v535_v32 = vmax.f32 %v517_v28, 0.0  ;;  %v465_v33 = vadd.f32 %v464_v30, %v257_v29 }
 0x104   :  { %v832_v34 = vpop.f32.mrf.mxu0  ;;  %v884_v35 = vpop.f32.mrf.mxu1 }
 0x105   :  { %v729_v36 = vpack.c.bf16 %v535_v32, %v534_v31  ;;  %v518_v40 = vadd.f32 %v1127_v39, %v465_v33 }
 0x106   :  { %v260_v37 = vpop.f32.mrf.mxu0  ;;  %v467_v38 = vpop.f32.mrf.mxu1 }
 0x107   :  { %758 = vst [vmem:[%s1179_s5 + $0x18] sm:$0xff] %v729_v36   ;;  %v468_v41 = vadd.f32 %v467_v38, %v260_v37  ;;  %v536_v47 = vmax.f32 %v518_v40, 0.0 }
 0x108   :  { %v833_v42 = vpop.f32.mrf.mxu0  ;;  %v885_v43 = vpop.f32.mrf.mxu1 }
 0x109   :  { %v519_v44 = vadd.f32 %v1127_v39, %v468_v41 }
 0x10a   :  { %v265_v45 = vpop.f32.mrf.mxu0  ;;  %v472_v46 = vpop.f32.mrf.mxu1 }
 0x10b   :  { %v537_v48 = vmax.f32 %v519_v44, 0.0  ;;  %v473_v49 = vadd.f32 %v472_v46, %v265_v45 }
 0x10c   :  { %v836_v50 = vpop.f32.mrf.mxu0  ;;  %v888_v51 = vpop.f32.mrf.mxu1 }
 0x10d   :  { %v734_v52 = vpack.c.bf16 %v537_v48, %v536_v47  ;;  %v520_v55 = vadd.f32 %v1127_v39, %v473_v49 }
 0x10e   :  { %v268_v53 = vpop.f32.mrf.mxu0  ;;  %v475_v54 = vpop.f32.mrf.mxu1 }
 0x10f   :  { %759 = vst [vmem:[%s1179_s5 + $0x20] sm:$0xff] %v734_v52   ;;  %v476_v56 = vadd.f32 %v475_v54, %v268_v53  ;;  %v538_v62 = vmax.f32 %v520_v55, 0.0 }
 0x110   :  { %v837_v57 = vpop.f32.mrf.mxu0  ;;  %v889_v58 = vpop.f32.mrf.mxu1 }
 0x111   :  { %v521_v59 = vadd.f32 %v1127_v39, %v476_v56 }
 0x112   :  { %v273_v60 = vpop.f32.mrf.mxu0  ;;  %v480_v61 = vpop.f32.mrf.mxu1 }
 0x113   :  { %v539_v63 = vmax.f32 %v521_v59, 0.0  ;;  %v481_v0 = vadd.f32 %v480_v61, %v273_v60 }
 0x114   :  { %v840_v1 = vpop.f32.mrf.mxu0  ;;  %v892_v2 = vpop.f32.mrf.mxu1 }
 0x115   :  { %v739_v3 = vpack.c.bf16 %v539_v63, %v538_v62  ;;  %v522_v6 = vadd.f32 %v1127_v39, %v481_v0 }
 0x116   :  { %v276_v4 = vpop.f32.mrf.mxu0  ;;  %v483_v5 = vpop.f32.mrf.mxu1 }
 0x117   :  { %760 = vst [vmem:[%s1179_s5 + $0x28] sm:$0xff] %v739_v3   ;;  %v484_v7 = vadd.f32 %v483_v5, %v276_v4  ;;  %v540_v13 = vmax.f32 %v522_v6, 0.0 }
 0x118   :  { %v841_v8 = vpop.f32.mrf.mxu0  ;;  %v893_v9 = vpop.f32.mrf.mxu1 }
 0x119   :  { %v523_v10 = vadd.f32 %v1127_v39, %v484_v7 }
 0x11a   :  { %v281_v11 = vpop.f32.mrf.mxu0  ;;  %v488_v12 = vpop.f32.mrf.mxu1 }
 0x11b   :  { %v541_v14 = vmax.f32 %v523_v10, 0.0  ;;  %v489_v15 = vadd.f32 %v488_v12, %v281_v11 }
 0x11c   :  { %v844_v16 = vpop.f32.mrf.mxu0  ;;  %v896_v17 = vpop.f32.mrf.mxu1 }
 0x11d   :  { %v744_v18 = vpack.c.bf16 %v541_v14, %v540_v13  ;;  %v524_v21 = vadd.f32 %v1127_v39, %v489_v15 }
 0x11e   :  { %v284_v19 = vpop.f32.mrf.mxu0  ;;  %v491_v20 = vpop.f32.mrf.mxu1 }
 0x11f   :  { %761 = vst [vmem:[%s1179_s5 + $0x30] sm:$0xff] %v744_v18   ;;  %v492_v22 = vadd.f32 %v491_v20, %v284_v19  ;;  %v542_v28 = vmax.f32 %v524_v21, 0.0 }
 0x120   :  { %v845_v23 = vpop.f32.mrf.mxu0  ;;  %v897_v24 = vpop.f32.mrf.mxu1 }
 0x121   :  { %v525_v25 = vadd.f32 %v1127_v39, %v492_v22 }
 0x122   :  { %v289_v26 = vpop.f32.mrf.mxu0  ;;  %v496_v27 = vpop.f32.mrf.mxu1 }
 0x123   :  { %v543_v29 = vmax.f32 %v525_v25, 0.0  ;;  %v497_v30 = vadd.f32 %v496_v27, %v289_v26 }
 0x124   :  { %v848_v31 = vpop.f32.mrf.mxu0  ;;  %v900_v32 = vpop.f32.mrf.mxu1 }
 0x125   :  { %v749_v33 = vpack.c.bf16 %v543_v29, %v542_v28  ;;  %v526_v36 = vadd.f32 %v1127_v39, %v497_v30 }
 0x126   :  { %v292_v34 = vpop.f32.mrf.mxu0  ;;  %v499_v35 = vpop.f32.mrf.mxu1 }
 0x127   :  { %762 = vst [vmem:[%s1179_s5 + $0x38] sm:$0xff] %v749_v33   ;;  %v500_v37 = vadd.f32 %v499_v35, %v292_v34  ;;  %v544_v42 = vmax.f32 %v526_v36, 0.0 }
 0x128   :  { %v849_v38 = vpop.f32.mrf.mxu0  ;;  %v901_v40 = vpop.f32.mrf.mxu1 }
 0x129   :  { %v527_v41 = vadd.f32 %v1127_v39, %v500_v37 }
 0x12b   :  { %v545_v43 = vmax.f32 %v527_v41, 0.0 }
 0x12d   :  { %v754_v44 = vpack.c.bf16 %v545_v43, %v544_v42 }
 0x12f   :  { %763 = vst [vmem:[%s1179_s5 + $0x40] sm:$0xff] %v754_v44  }

</bundles_post_ra>
